<compile_context>
chip_gen: v5e
topology: v5e:2x2
jax: 0.10.0
libtpu: 0.0.40
codegen_flags: <defaults>
</compile_context>

<pallas_src>
import functools
import math

import jax
import jax.numpy as jnp
from jax import lax
from jax.experimental import pallas as pl
from jax.experimental.pallas import tpu as pltpu


_INV_SQRT2 = 1.0 / math.sqrt(2.0)
_SQRT_2_OVER_PI = math.sqrt(2.0 / math.pi)


def _gelu(x, approximate):
    if approximate:
        # tanh form: transcendental goes to the (otherwise idle) EUP slot.
        return 0.5 * x * (1.0 + jnp.tanh(_SQRT_2_OVER_PI * (x + 0.044715 * x * x * x)))
    # PyTorch nn.GELU default ('none') = exact erf formulation.
    return 0.5 * x * (1.0 + lax.erf(x * _INV_SQRT2))


def ffn_kernel(x_ref, w1_ref, b1_ref, w2_ref, b2_ref, o_ref, acc_ref, *,
               approximate_gelu):
    h_idx = pl.program_id(1)

    @pl.when(h_idx == 0)
    def _():
        acc_ref[...] = jnp.zeros_like(acc_ref)

    # bf16 MXU operands, f32 accumulation.  x arrives un-cast (f32 or upstream
    # bf16); the cast happens here so the wrapper does not add an extra HBM pass.
    x = x_ref[...].astype(jnp.bfloat16)
    h = jnp.dot(x, w1_ref[...], preferred_element_type=jnp.float32) + b1_ref[...]
    h = _gelu(h, approximate_gelu)                        # f32 on VPU/EUP
    # TODO(synk): Dropout layers are identity in eval mode (p=0.0) and are omitted.
    acc_ref[...] += jnp.dot(h.astype(jnp.bfloat16), w2_ref[...],
                            preferred_element_type=jnp.float32)

    @pl.when(h_idx == pl.num_programs(1) - 1)
    def _():
        o_ref[...] = (acc_ref[...] + b2_ref[...]).astype(o_ref.dtype)


@functools.lru_cache(maxsize=None)
def _vmem_limit_bytes():
    # Per-generation scoped-VMEM budget: ~48 MiB on v7x (64 MiB/TC physical),
    # up to 96 MiB on v5e/v6e (128 MiB physical).
    try:
        cap = int(pltpu.get_tpu_info().vmem_capacity_bytes)
    except Exception:
        cap = 64 * 1024 * 1024
    return min((cap * 3) // 4, 96 * 1024 * 1024)


def _choose_row_tile(M, row_tile):
    """Sublane-aligned TM that (preferably) divides M (no padding) and leaves
    >= 2 row tiles so v7x's two TensorCores both get work on the parallel axis."""
    if M <= 8:
        return M, M                                  # single full-extent tile
    target = max(8, min(row_tile, M))
    if M >= 16:
        target = min(target, max(8, (M // 2) // 8 * 8))
    target -= target % 8
    for tm in range(target, 7, -8):                  # largest TM <= target, TM | M
        if M % tm == 0:
            return tm, M
    # Rarely-hit fallback: pad the row axis up to a TM multiple.
    return target, pl.cdiv(M, target) * target


def _choose_hidden_tile(H, hidden_tile):
    """Lane-aligned TH (multiple of 128) dividing H; full H if not 128-aligned."""
    if H % 128 != 0 or H <= 128:
        return H
    target = max(128, (min(hidden_tile, H) // 128) * 128)
    for th in range(target, 127, -128):
        if H % th == 0:
            return th
    return H


def feedforward(x, params, *, row_tile=512, hidden_tile=512,
                approximate_gelu=False, out_dtype=None):
    """Pallas FeedForward.

    x: (..., dim), f32 or bf16.
    params: (w1, b1, w2, b2) with w1:(dim, hidden), b1:(hidden,),
            w2:(hidden, dim), b2:(dim,)  (weights stored as (in, out), i.e.
            y = x @ W + b, equivalent to PyTorch's x @ W_pt.T + b).
            Pre-cast w1/w2 to bf16 once at parameter-init time for best perf.
    """
    w1, b1, w2, b2 = params
    D = x.shape[-1]
    H = w1.shape[-1]
    orig_shape = x.shape
    out_dtype = x.dtype if out_dtype is None else out_dtype

    # No-ops when weights were pre-cast at init time (recommended).
    if w1.dtype != jnp.bfloat16:
        w1 = w1.astype(jnp.bfloat16)
    if w2.dtype != jnp.bfloat16:
        w2 = w2.astype(jnp.bfloat16)
    b1_2d = b1.reshape(1, H).astype(jnp.float32)
    b2_2d = b2.reshape(1, D).astype(jnp.float32)

    # Fold all leading dims into one row axis.
    x2d = x.reshape(-1, D)
    M = x2d.shape[0]

    TM, Mp = _choose_row_tile(M, row_tile)
    if Mp != M:
        # Fallback only; typical transformer shapes pick TM | M above.
        x2d = jnp.pad(x2d, ((0, Mp - M), (0, 0)))
    TH = _choose_hidden_tile(H, hidden_tile)

    grid = (Mp // TM, H // TH)
    kernel = functools.partial(ffn_kernel, approximate_gelu=approximate_gelu)

    out = pl.pallas_call(
        kernel,
        out_shape=jax.ShapeDtypeStruct((Mp, D), out_dtype),
        grid=grid,
        in_specs=[
            pl.BlockSpec((TM, D), lambda i, h: (i, 0)),   # x row tile (const in h)
            pl.BlockSpec((D, TH), lambda i, h: (0, h)),   # w1 column chunk
            pl.BlockSpec((1, TH), lambda i, h: (0, h)),   # b1 chunk
            pl.BlockSpec((TH, D), lambda i, h: (h, 0)),   # w2 row chunk
            pl.BlockSpec((1, D), lambda i, h: (0, 0)),    # b2 (constant)
        ],
        out_specs=pl.BlockSpec((TM, D), lambda i, h: (i, 0)),
        scratch_shapes=[pltpu.VMEM((TM, D), jnp.float32)],
        compiler_params=pltpu.CompilerParams(
            dimension_semantics=("parallel", "arbitrary"),
            vmem_limit_bytes=_vmem_limit_bytes()),
    )(x2d, w1, b1_2d, w2, b2_2d)

    if Mp != M:
        out = out[:M]
    return out.reshape(orig_shape[:-1] + (D,))


def _ffn_reference(x, params):
    w1, b1, w2, b2 = params
    h = _gelu(x @ w1 + b1, approximate=False)
    return h @ w2 + b2


if __name__ == "__main__":
    key = jax.random.PRNGKey(0)
    kx, k1, k2, k3, k4 = jax.random.split(key, 5)

    batch, seq, dim, hidden = 2, 128, 128, 256
    x = jax.random.normal(kx, (batch, seq, dim), jnp.float32)

    scale = 0.02
    # Weights pre-cast to bf16 once (parameter-init time); biases stay f32.
    w1 = (scale * jax.random.normal(k1, (dim, hidden), jnp.float32)).astype(jnp.bfloat16)
    b1 = scale * jax.random.normal(k2, (hidden,), jnp.float32)
    w2 = (scale * jax.random.normal(k3, (hidden, dim), jnp.float32)).astype(jnp.bfloat16)
    b2 = scale * jax.random.normal(k4, (dim,), jnp.float32)
    params = (w1, b1, w2, b2)

    out = feedforward(x, params)
    out = jax.block_until_ready(out)
    assert out.shape == (batch, seq, dim)
    assert out.dtype == x.dtype

    # Sanity check against a pure-JAX f32 reference using the same (bf16-rounded)
    # weight values (loose tol: bf16 MXU operands inside the kernel).
    ref = _ffn_reference(x, (w1.astype(jnp.float32), b1, w2.astype(jnp.float32), b2))
    max_err = float(jnp.max(jnp.abs(out - ref)))
    assert math.isfinite(max_err) and max_err < 5e-2, f"max_err={max_err}"

    print("KERNEL_OK")
</pallas_src>

<mosaic_0001>
module attributes {stable_mosaic.version = 11 : i64} {
  func.func @ffn_kernel(%arg0: i32, %arg1: i32, %arg2: memref<128x128xf32, #tpu.memory_space<vmem>>, %arg3: memref<128x256xbf16, #tpu.memory_space<vmem>>, %arg4: memref<1x256xf32, #tpu.memory_space<vmem>>, %arg5: memref<256x128xbf16, #tpu.memory_space<vmem>>, %arg6: memref<1x128xf32, #tpu.memory_space<vmem>>, %arg7: memref<128x128xf32, #tpu.memory_space<vmem>>, %arg8: memref<128x128xf32, #tpu.memory_space<vmem>>) attributes {dimension_semantics = [#tpu.dimension_semantics<parallel>, #tpu.dimension_semantics<arbitrary>], iteration_bounds = array<i64: 2, 1>, scalar_prefetch = 0 : i64, scratch_operands = 1 : i64, tpu.core_type = #tpu.core_type<tc>, window_params = [{transform_indices = @transform_0, window_bounds = array<i64: 128, 128>}, {transform_indices = @transform_1, window_bounds = array<i64: 128, 256>}, {transform_indices = @transform_2, window_bounds = array<i64: 1, 256>}, {transform_indices = @transform_3, window_bounds = array<i64: 256, 128>}, {pipeline_mode = #tpu.pipeline_mode<synchronous>, transform_indices = @transform_4, window_bounds = array<i64: 1, 128>}, {transform_indices = @transform_5, window_bounds = array<i64: 128, 128>}]} {
    %c0_i32 = arith.constant 0 : i32
    %0 = arith.cmpi eq, %arg1, %c0_i32 : i32
    %1 = arith.extui %0 : i1 to i32
    %c0_i32_0 = arith.constant 0 : i32
    %2 = arith.cmpi ne, %1, %c0_i32_0 : i32
    scf.if %2 {
      %cst_18 = arith.constant 0.000000e+00 : f32
      %27 = vector.broadcast %cst_18 : f32 to vector<128x128xf32>
      %c0_19 = arith.constant 0 : index
      %c0_20 = arith.constant 0 : index
      %28 = vector.load %arg8[%c0_19, %c0_20] : memref<128x128xf32, #tpu.memory_space<vmem>>, vector<128x128xf32>
      tpu.vector_store %arg8[%c0_19, %c0_20], %27 {strides = array<i32>} : memref<128x128xf32, #tpu.memory_space<vmem>>, vector<128x128xf32>,
    } else {
    }
    %c0 = arith.constant 0 : index
    %c0_1 = arith.constant 0 : index
    %3 = vector.load %arg2[%c0, %c0_1] : memref<128x128xf32, #tpu.memory_space<vmem>>, vector<128x128xf32>
    %4 = arith.truncf %3 : vector<128x128xf32> to vector<128x128xbf16>
    %c0_2 = arith.constant 0 : index
    %c0_3 = arith.constant 0 : index
    %5 = vector.load %arg3[%c0_2, %c0_3] : memref<128x256xbf16, #tpu.memory_space<vmem>>, vector<128x256xbf16>
    %cst = arith.constant dense<0.000000e+00> : vector<128x256xf32>
    %6 = tpu.matmul %4, %5, %cst {dimension_numbers = #tpu.dot_dimension_numbers<[1], [0], [0], [1], [0, 0, 1, 1], [], []>} : vector<128x128xbf16>, vector<128x256xbf16>, vector<128x256xf32> -> vector<128x256xf32>
    %c0_4 = arith.constant 0 : index
    %c0_5 = arith.constant 0 : index
    %7 = vector.load %arg4[%c0_4, %c0_5] : memref<1x256xf32, #tpu.memory_space<vmem>>, vector<1x256xf32>
    %8 = vector.broadcast %7 : vector<1x256xf32> to vector<128x256xf32>
    %9 = arith.addf %6, %8 : vector<128x256xf32>
    %cst_6 = arith.constant 5.000000e-01 : f32
    %10 = vector.broadcast %cst_6 : f32 to vector<128x256xf32>
    %11 = arith.mulf %10, %9 : vector<128x256xf32>
    %cst_7 = arith.constant 0.707106769 : f32
    %12 = vector.broadcast %cst_7 : f32 to vector<128x256xf32>
    %13 = arith.mulf %9, %12 : vector<128x256xf32>
    %14 = math.erf %13 : vector<128x256xf32>
    %cst_8 = arith.constant 1.000000e+00 : f32
    %15 = vector.broadcast %cst_8 : f32 to vector<128x256xf32>
    %16 = arith.addf %15, %14 : vector<128x256xf32>
    %17 = arith.mulf %11, %16 : vector<128x256xf32>
    %c0_9 = arith.constant 0 : index
    %c0_10 = arith.constant 0 : index
    %18 = vector.load %arg8[%c0_9, %c0_10] : memref<128x128xf32, #tpu.memory_space<vmem>>, vector<128x128xf32>
    %19 = arith.truncf %17 : vector<128x256xf32> to vector<128x256xbf16>
    %c0_11 = arith.constant 0 : index
    %c0_12 = arith.constant 0 : index
    %20 = vector.load %arg5[%c0_11, %c0_12] : memref<256x128xbf16, #tpu.memory_space<vmem>>, vector<256x128xbf16>
    %cst_13 = arith.constant dense<0.000000e+00> : vector<128x128xf32>
    %21 = tpu.matmul %19, %20, %cst_13 {dimension_numbers = #tpu.dot_dimension_numbers<[1], [0], [0], [1], [0, 0, 1, 1], [], []>} : vector<128x256xbf16>, vector<256x128xbf16>, vector<128x128xf32> -> vector<128x128xf32>
    %22 = arith.addf %18, %21 : vector<128x128xf32>
    %c0_14 = arith.constant 0 : index
    %c0_15 = arith.constant 0 : index
    %23 = vector.load %arg8[%c0_14, %c0_15] : memref<128x128xf32, #tpu.memory_space<vmem>>, vector<128x128xf32>
    tpu.vector_store %arg8[%c0_14, %c0_15], %22 {strides = array<i32>} : memref<128x128xf32, #tpu.memory_space<vmem>>, vector<128x128xf32>,
    %c0_i32_16 = arith.constant 0 : i32
    %24 = arith.cmpi eq, %arg1, %c0_i32_16 : i32
    %25 = arith.extui %24 : i1 to i32
    %c0_i32_17 = arith.constant 0 : i32
    %26 = arith.cmpi ne, %25, %c0_i32_17 : i32
    scf.if %26 {
      %c0_18 = arith.constant 0 : index
      %c0_19 = arith.constant 0 : index
      %27 = vector.load %arg8[%c0_18, %c0_19] : memref<128x128xf32, #tpu.memory_space<vmem>>, vector<128x128xf32>
      %c0_20 = arith.constant 0 : index
      %c0_21 = arith.constant 0 : index
      %28 = vector.load %arg6[%c0_20, %c0_21] : memref<1x128xf32, #tpu.memory_space<vmem>>, vector<1x128xf32>
      %29 = vector.broadcast %28 : vector<1x128xf32> to vector<128x128xf32>
      %30 = arith.addf %27, %29 : vector<128x128xf32>
      %c0_22 = arith.constant 0 : index
      %c0_23 = arith.constant 0 : index
      %31 = vector.load %arg7[%c0_22, %c0_23] : memref<128x128xf32, #tpu.memory_space<vmem>>, vector<128x128xf32>
      tpu.vector_store %arg7[%c0_22, %c0_23], %30 {strides = array<i32>} : memref<128x128xf32, #tpu.memory_space<vmem>>, vector<128x128xf32>,
    } else {
    }
    return
  }
  func.func @transform_0(%arg0: i32, %arg1: i32) -> (i32, i32) {
    %c0_i32 = arith.constant 0 : i32
    %c0_i32_0 = arith.constant 0 : i32
    return %arg0, %c0_i32 : i32, i32
  }
  func.func @transform_1(%arg0: i32, %arg1: i32) -> (i32, i32) {
    %c0_i32 = arith.constant 0 : i32
    %c0_i32_0 = arith.constant 0 : i32
    return %c0_i32, %arg1 : i32, i32
  }
  func.func @transform_2(%arg0: i32, %arg1: i32) -> (i32, i32) {
    %c0_i32 = arith.constant 0 : i32
    %c0_i32_0 = arith.constant 0 : i32
    return %c0_i32, %arg1 : i32, i32
  }
  func.func @transform_3(%arg0: i32, %arg1: i32) -> (i32, i32) {
    %c0_i32 = arith.constant 0 : i32
    %c0_i32_0 = arith.constant 0 : i32
    return %arg1, %c0_i32 : i32, i32
  }
  func.func @transform_4(%arg0: i32, %arg1: i32) -> (i32, i32) {
    %c0_i32 = arith.constant 0 : i32
    %c0_i32_0 = arith.constant 0 : i32
    %c0_i32_1 = arith.constant 0 : i32
    return %c0_i32, %c0_i32_0 : i32, i32
  }
  func.func @transform_5(%arg0: i32, %arg1: i32) -> (i32, i32) {
    %c0_i32 = arith.constant 0 : i32
    %c0_i32_0 = arith.constant 0 : i32
    return %arg0, %c0_i32 : i32, i32
  }
}

</mosaic_0001>

<bundles_post_ra>
// kernel: tpu_custom_call.1
= control target key start
LH: loop header
LB: loop body
LE: loop exit
PB: predicated region body
PF: predicated region fallthrough
CT: control target
= control target key end

     0   :  { %s4638_s0 = inlined_call_operand.hbm [shape: f32[256,128], index: 0, kind: input, shape index: {}]   ;;  %s4639_s1 = inlined_call_operand.hbm [shape: bf16[128,256], index: 1, kind: input, shape index: {}]   ;;  %s4640_s2 = inlined_call_operand.hbm [shape: f32[1,256], index: 2, kind: input, shape index: {}]   ;;  %s4641_s3 = inlined_call_operand.hbm [shape: bf16[256,128], index: 3, kind: input, shape index: {}]   ;;  %s4642_s4 = inlined_call_operand.vmem [shape: f32[1,128], index: 4, kind: input, shape index: {}]   ;;  %s4643_s5 = inlined_call_operand.hbm [shape: f32[256,128], index: 5, kind: output, shape index: {}]  }
   0x1   :  { %4655 = sst [smem:[#allocation40_spill]] %s4639_s1 }
   0x2   :  { %4656 = sst [smem:[#allocation41_spill]] %s4640_s2 }
   0x3   :  { %4657 = sst [smem:[#allocation42_spill]] %s4641_s3 }
   0x4   :  { %10 = vsyncpa [#allocation4], 0 }
   0x5   :  { %12 = vsyncpa [#allocation4 + $0x1], 0 }
   0x6   :  { %13 = vsyncpa [#allocation7], 0 }
   0x7   :  { %14 = vsyncpa [#allocation10], 0 }
   0x8   :  { %15 = vsyncpa [#allocation5], 0 }
   0x9   :  { %17 = vsyncpa [#allocation5 + $0x1], 0  ;;  %s3092_s18 = smov 0   ;;  %s3094_s19 = smov 0  }
   0xa   :  { %s3096_s20 = smov 0   ;;  %s3098_s21 = smov 0  }
   0xb   :  { %s3100_s22 = smov 0   ;;  %s3102_s23 = smov 0  }
   0xc LB: > { %s2462_s24 = sadd.s32 4294967295, %s3051_s23   ;;  %s2463_s25 = sadd.s32 4294967294, %s3051_s23   ;;  %s3051_s23 = sphi %s3102_s23, %s23_s23   ;;  %s3047_s22 = sphi %s3100_s22, %s4779_s22   ;;  %s3043_s21 = sphi %s3098_s21, %s4778_s21   ;;  %s3039_s20 = sphi %s3096_s20, %s4777_s20   ;;  %s3035_s19 = sphi %s3094_s19, %s4776_s19   ;;  %s3031_s18 = sphi %s3092_s18, %s4775_s18  }
   0xd   : > { %p55_p0 = scmp.ne.s32.totalorder %s3035_s19, %s3031_s18  ;;  %p3126_p1 = scmp.eq.s32.totalorder %s2462_s24, 0 }
   0xe   : > { %p3130_p2 = scmp.eq.s32.totalorder %s2462_s24, 1  ;;  %p184_p3 = scmp.eq.s32.totalorder %s2463_s25, 1 }
   0xf   : > { %p3136_p4 = por %p3126_p1, %p55_p0  ;;  %p2464_p5 = scmp.ge.s32.totalorder %s3051_s23, 1 }
  0x10   : > { %p3141_p6 = por %p184_p3, %p55_p0  ;;  %p191_p7 = scmp.lt.s32.totalorder %s3051_s23, 3 }
  0x11   : > { %s4662_s1 = sld [smem:[#allocation40_spill]]  ;;  %s3053_s9 = smov [#allocation6]  }
  0x12   : > { %p3149_p8 = pnand %p2464_p5, %p191_p7  ;;  %s207_s10 = sshll.u32 %s3053_s9, 4  ;;  %s208_s10 = int_to_ptr.vmem [resolvable:$true] %s207_s10 }
  0x13   : > { %p2468_p11 = scmp.ge.s32.totalorder %s3051_s23, 2  ;;  %s4665_s2 = sld [smem:[#allocation41_spill]] }
  0x14   : > { %p2693_p9 = pneg %p3149_p8  ;;  %s4644_s15 = smov 128  }
  0x15   : > { %s4645_s16 = smov 8   ;;  %s3056_s17 = smov [#allocation8]  }
  0x16   : > { %p3157_p10 = pnand %p2693_p9, %p3126_p1  ;;  %s224_s24 = sshll.u32 %s3056_s17, 4  ;;  %s225_s24 = int_to_ptr.vmem [resolvable:$true] %s224_s24 }
  0x17   : > { %s205_s7 = sshll.u32 %s4662_s1, 4  ;;  %s4666_s3 = sld [smem:[#allocation42_spill]]  ;;  %s206_s7 = int_to_ptr.hbm [resolvable:$true] %s205_s7 }
  0x18   : > { %2696 = dma.hbm_to_vmem [thread:$0]  (!%p3157_p10), %s206_s7, 2048, %s208_s10, [#allocation7], %s4644_s15, %s4644_s15, %s4645_s16  }
  0x19   : > { %s222_s14 = sshll.u32 %s4665_s2, 4  ;;  %s3057_s9 = smov [#allocation9]   ;;  %s223_s14 = int_to_ptr.hbm [resolvable:$true] %s222_s14 }
  0x1a   : > { %2699 = dma.hbm_to_vmem [thread:$0]  (!%p3157_p10), %s223_s14, 32, %s225_s24, [#allocation7]  }
  0x1b   : > { %s238_s12 = sshll.u32 %s3057_s9, 4  ;;  %s3058_s13 = smov 64   ;;  %s239_s12 = int_to_ptr.vmem [resolvable:$true] %s238_s12 }
  0x1c   : > { %s3059_s7 = smov 4   ;;  %s42_s10 = sadd.s32 1, %s3039_s20 }
  0x1d   : > { %s236_s6 = sshll.u32 %s4666_s3, 4  ;;  %s35_s17 = sadd.s32 1, %s3047_s22  ;;  %s237_s6 = int_to_ptr.hbm [resolvable:$true] %s236_s6 }
  0x1e   : > { %2702 = dma.hbm_to_vmem [thread:$0]  (!%p3157_p10), %s237_s6, 2048, %s239_s12, [#allocation10], %s3058_s13, %s3058_s13, %s3059_s7  }
  0x1f   : > { %p49_p12 = scmp.ne.s32.totalorder %s3039_s20, %s3035_s19  ;;  %p37_p13 = scmp.ge.s32.totalorder %s35_s17, 2 }
  0x20   : > { %p50_p0 = scmp.eq.s32.totalorder %s3051_s23, 0  ;;  %p2714_p5 = scmp.lt.s32.totalorder %s3051_s23, 2 }
  0x21   : > { %p3184_p3 = por %p3130_p2, %p49_p12  ;;  %s4781_s17 = smov (%p37_p13, %s35_s17), 0 }
  0x22   : > { %p3191_p7 = por %p50_p0, %p49_p12  ;;  %s255_s11 = sand.u32 1, %s3039_s20  }
  0x23   : > { %s39_s24 = ssub.s32 %s3047_s22, %s4781_s17  ;;  %s2469_s30 = sshll.u32 %s255_s11, 7 }
  0x24   : > { %p40_p9 = scmp.eq.s32.totalorder %s39_s24, 0  ;;  %s2643_s6 = sshll.u32 %s3047_s22, 7 }
  0x25   : > { %s264_s13 = scalar_lea.hbm %s4638_s0, %s2643_s6  ;;  %s259_s7 = scalar_lea.vmem [#allocation3], %s2469_s30 }
  0x26   : > { %s3200_s27 = scalar_select %p40_p9, %s3039_s20, %s42_s10  }
  0x27   : > { %s267_s15 = sshll.u32 %s259_s7, 4  ;;  %s265_s16 = sshll.u32 %s264_s13, 4  ;;  %s268_s15 = int_to_ptr.vmem [resolvable:$true] %s267_s15  ;;  %s266_s16 = int_to_ptr.hbm [resolvable:$true] %s265_s16 }
  0x28   : > { %p2704_p2 = pnand %p2714_p5, %p3191_p7  ;;  %s256_s1 = scalar_lea.sflag [#allocation4], %s255_s11 }
  0x29   : > { %s4669_s2 = smov 8   ;;  %s4670_s3 = smov 128  }
  0x2a   : > { %2706 = dma.hbm_to_vmem [thread:$0]  (!%p2704_p2), %s266_s16, 2048, %s268_s15, %s256_s1, %s4670_s3, %s4670_s3, %s4669_s2  }
  0x2b   : > { %279 = sbr.rel (%p3149_p8) target bundleno = 739 (0x2e3), region = 40 }
  0x30   : > { %s3215_s10 = sand.u32 1, %s3035_s19  }
  0x31   : > { %s2473_s24 = sshll.u32 %s3215_s10, 7  ;;  %s282_s30 = scalar_lea.sflag [#allocation4], %s3215_s10 }
  0x32   : > { %s3221_s14 = scalar_lea.vmem [#allocation3], %s2473_s24 }
  0x33   : > { %3014 = dma.done.wait (%p3136_p4), %s282_s30, 2048  }
  0x34   : > { %3016 = vsyncadd (%p3136_p4), %s282_s30, 4294965248 }
  0x35   : > { %3018 = dma.done.wait (%p3126_p1), [#allocation7], 2080  }
  0x36   : > { %3020 = vsyncadd (%p3126_p1), [#allocation7], 4294965216 }
  0x37   : > { %3022 = dma.done.wait (%p3126_p1), [#allocation10], 2048  }
  0x38   : > { %3024 = vsyncadd (%p3126_p1), [#allocation10], 4294965248  ;;  %v2536_v0 = vld [vmem:[#allocation6 + $0x70] sm:$0xf]  ;;  %v2659_v1 = vld [vmem:[#allocation6 + $0x74] sm:$0xf0] }
  0x39   : > { %v2658_v2 = vld [vmem:[#allocation6 + $0x74] sm:$0xf]  ;;  %v2537_v3 = vor.u32 %v2659_v1, %v2536_v0  ;;  %v2538_v4 = vld [vmem:[#allocation6 + $0x78] sm:$0xf0]  ;;  %v2528_v5 = vld [vmem:[#allocation6 + $0x60] sm:$0xf] }
  0x3a   : > { %v2657_v6 = vld [vmem:[#allocation6 + $0x64] sm:$0xf0]  ;;  %v2541_v7 = vor.u32 %v2658_v2, %v2538_v4  ;;  %v2656_v8 = vld [vmem:[#allocation6 + $0x64] sm:$0xf]  ;;  %v2530_v9 = vld [vmem:[#allocation6 + $0x68] sm:$0xf0] }
  0x3b   : > { %479 = vmatpush.bf16.msra.mxu0 %v2537_v3  ;;  %v2529_v10 = vor.u32 %v2657_v6, %v2528_v5  ;;  %v2533_v11 = vor.u32 %v2656_v8, %v2530_v9  ;;  %v2520_v12 = vld [vmem:[#allocation6 + $0x50] sm:$0xf]  ;;  %v2655_v13 = vld [vmem:[#allocation6 + $0x54] sm:$0xf0]  ;;  %v2654_v14 = vld [vmem:[#allocation6 + $0x54] sm:$0xf] }
  0x3c   : > { %528 = vmatpush.bf16.msra.mxu1 %v2541_v7  ;;  %v2522_v15 = vld [vmem:[#allocation6 + $0x58] sm:$0xf0]  ;;  %v2521_v16 = vor.u32 %v2655_v13, %v2520_v12  ;;  %v2512_v18 = vld [vmem:[#allocation6 + $0x40] sm:$0xf]  ;;  %v2653_v19 = vld [vmem:[#allocation6 + $0x44] sm:$0xf0] }
  0x3d   : > { %v2525_v17 = vor.u32 %v2654_v14, %v2522_v15  ;;  %v2652_v20 = vld [vmem:[#allocation6 + $0x44] sm:$0xf]  ;;  %v2514_v21 = vld [vmem:[#allocation6 + $0x48] sm:$0xf0]  ;;  %v2513_v22 = vor.u32 %v2653_v19, %v2512_v18  ;;  %v2504_v24 = vld [vmem:[#allocation6 + $0x30] sm:$0xf] }
  0x3e   : > { %v2517_v23 = vor.u32 %v2652_v20, %v2514_v21  ;;  %v2651_v25 = vld [vmem:[#allocation6 + $0x34] sm:$0xf0]  ;;  %v2650_v26 = vld [vmem:[#allocation6 + $0x34] sm:$0xf]  ;;  %v2506_v27 = vld [vmem:[#allocation6 + $0x38] sm:$0xf0] }
  0x3f   : > { %480 = vmatpush.bf16.msra.mxu0 %v2529_v10  ;;  %v2505_v28 = vor.u32 %v2651_v25, %v2504_v24  ;;  %v2509_v29 = vor.u32 %v2650_v26, %v2506_v27  ;;  %v2496_v30 = vld [vmem:[#allocation6 + $0x20] sm:$0xf]  ;;  %v2649_v31 = vld [vmem:[#allocation6 + $0x24] sm:$0xf0]  ;;  %v2648_v32 = vld [vmem:[#allocation6 + $0x24] sm:$0xf] }
  0x40   : > { %529 = vmatpush.bf16.msra.mxu1 %v2533_v11  ;;  %v2498_v33 = vld [vmem:[#allocation6 + $0x28] sm:$0xf0]  ;;  %v2497_v34 = vor.u32 %v2649_v31, %v2496_v30  ;;  %v2488_v36 = vld [vmem:[#allocation6 + $0x10] sm:$0xf]  ;;  %v2647_v37 = vld [vmem:[#allocation6 + $0x14] sm:$0xf0] }
  0x41   : > { %v2501_v35 = vor.u32 %v2648_v32, %v2498_v33  ;;  %v2646_v38 = vld [vmem:[#allocation6 + $0x14] sm:$0xf]  ;;  %v2490_v39 = vld [vmem:[#allocation6 + $0x18] sm:$0xf0]  ;;  %v2489_v40 = vor.u32 %v2647_v37, %v2488_v36  ;;  %v2480_v42 = vld [vmem:[#allocation6] sm:$0xf] }
  0x42   : > { %v2493_v41 = vor.u32 %v2646_v38, %v2490_v39  ;;  %v2645_v43 = vld [vmem:[#allocation6 + $0x4] sm:$0xf0]  ;;  %v2644_v44 = vld [vmem:[#allocation6 + $0x4] sm:$0xf]  ;;  %v2482_v45 = vld [vmem:[#allocation6 + $0x8] sm:$0xf0] }
  0x43   : > { %481 = vmatpush.bf16.msra.mxu0 %v2521_v16  ;;  %v2481_v46 = vor.u32 %v2645_v43, %v2480_v42  ;;  %v353_v47 = vld [vmem:[%s3221_s14] sm:$0xff]  ;;  %v354_v48 = vld [vmem:[%s3221_s14 + $0x8] sm:$0xff]  ;;  %v2485_v49 = vor.u32 %v2644_v44, %v2482_v45  ;;  %v355_v51 = vld [vmem:[%s3221_s14 + $0x10] sm:$0xff]  ;;  %s4553_s3 = scalar_lea.vmem [#allocation11], %s2473_s24  ;;  %s2676_s26 = sshll.u32 %s3043_s21, 7 }
  0x44   : > { %530 = vmatpush.bf16.msra.mxu1 %v2525_v17  ;;  %v369_v50 = vpack.c.bf16 %v354_v48, %v353_v47  ;;  %v356_v52 = vld [vmem:[%s3221_s14 + $0x18] sm:$0xff]  ;;  %v357_v54 = vld [vmem:[%s3221_s14 + $0x20] sm:$0xff]  ;;  %v358_v55 = vld [vmem:[%s3221_s14 + $0x28] sm:$0xff]  ;;  %s2342_s15 = scalar_lea.hbm %s4643_s5, %s2676_s26  ;;  %s2343_s16 = sshll.u32 %s4553_s3, 4  ;;  %s2344_s16 = int_to_ptr.vmem [resolvable:$true] %s2343_s16 }
  0x45   : > { %v370_v53 = vpack.c.bf16 %v356_v52, %v355_v51  ;;  %v371_v56 = vpack.c.bf16 %v358_v55, %v357_v54  ;;  %v359_v57 = vld [vmem:[%s3221_s14 + $0x30] sm:$0xff]  ;;  %v360_v58 = vld [vmem:[%s3221_s14 + $0x38] sm:$0xff]  ;;  %v361_v60 = vld [vmem:[%s3221_s14 + $0x40] sm:$0xff]  ;;  %s2345_s11 = sshll.u32 %s2342_s15, 4  ;;  %s2331_s6 = scalar_lea.sflag [#allocation5], %s3215_s10  ;;  %s2346_s11 = int_to_ptr.hbm [resolvable:$true] %s2345_s11 }
  0x46   : > { %v372_v59 = vpack.c.bf16 %v360_v58, %v359_v57  ;;  %v362_v61 = vld [vmem:[%s3221_s14 + $0x48] sm:$0xff]  ;;  %v363_v63 = vld [vmem:[%s3221_s14 + $0x50] sm:$0xff]  ;;  %v364_v0 = vld [vmem:[%s3221_s14 + $0x58] sm:$0xff]  ;;  %s2975_s21 = sshra.s32 %s2346_s11, 4  ;;  %s2981_s7 = scalar_lea.hbm %s4643_s5, 256  ;;  %s2976_s21 = int_to_ptr.hbm [resolvable:$true] %s2975_s21 }
  0x47   : > { %482 = vmatpush.bf16.msra.mxu0 %v2513_v22  ;;  %v373_v62 = vpack.c.bf16 %v362_v61, %v361_v60  ;;  %v374_v1 = vpack.c.bf16 %v364_v0, %v363_v63  ;;  %v365_v2 = vld [vmem:[%s3221_s14 + $0x60] sm:$0xff]  ;;  %v366_v3 = vld [vmem:[%s3221_s14 + $0x68] sm:$0xff]  ;;  %v367_v5 = vld [vmem:[%s3221_s14 + $0x70] sm:$0xff]  ;;  %s2977_s9 = scalar_lea.hbm %s2976_s21, 128  ;;  %p2982_p10 = scmp.lt.s32.totalorder %s2976_s21, %s4643_s5 }
  0x48   : > { %531 = vmatpush.bf16.msra.mxu1 %v2517_v23  ;;  %v375_v4 = vpack.c.bf16 %v366_v3, %v365_v2  ;;  %v368_v6 = vld [vmem:[%s3221_s14 + $0x78] sm:$0xff]  ;;  %v393_v8 = vld [vmem:[#allocation8] sm:$0x3]  ;;  %v2665_v26 = vld [vmem:[#allocation9 + $0x28] sm:$0xff]  ;;  %p2978_p1 = scmp.ne.s32.totalorder %s2976_s21, %s2977_s9  ;;  %p2983_p12 = scmp.lt.s32.totalorder %s2981_s7, %s2977_s9 }
  0x49   : > { %v376_v7 = vpack.c.bf16 %v368_v6, %v367_v5  ;;  %v3251_v9 = vperm.slane %v393_v8, 0  ;;  %v3253_v11 = vperm.slane %v393_v8, 1  ;;  %v2667_v13 = vld [vmem:[#allocation9 + $0x38] sm:$0xff]  ;;  %v2666_v17 = vld [vmem:[#allocation9 + $0x30] sm:$0xff]  ;;  %v2664_v33 = vld [vmem:[#allocation9 + $0x20] sm:$0xff] }
  0x4a   : > { %v2675_v14 = vld [vmem:[#allocation9 + $0x78] sm:$0xff]  ;;  %2145 = vmatpush.bf16.msra.mxu2 %v2667_v13  ;;  %v2674_v18 = vld [vmem:[#allocation9 + $0x70] sm:$0xff]  ;;  %v2669_v2 = vld [vmem:[#allocation9 + $0x48] sm:$0xff]  ;;  %p2979_p4 = pnand %p2978_p1, %p3184_p3  ;;  %p2984_p13 = por %p2983_p12, %p2982_p10 }
  0x4b   : > { %483 = vmatpush.bf16.msra.mxu0 %v2505_v28  ;;  %2194 = vmatpush.bf16.msra.mxu3 %v2675_v14  ;;  %v2663_v44 = vld [vmem:[#allocation9 + $0x18] sm:$0xff]  ;;  %v2662_v52 = vld [vmem:[#allocation9 + $0x10] sm:$0xff] }
  0x4c   : > { %532 = vmatpush.bf16.msra.mxu1 %v2509_v29  ;;  %v2673_v29 = vld [vmem:[#allocation9 + $0x68] sm:$0xff]  ;;  %v2671_v45 = vld [vmem:[#allocation9 + $0x58] sm:$0xff]  ;;  %p2980_p8 = pneg %p2979_p4 }
  0x4e   : > { %2146 = vmatpush.bf16.msra.mxu2 %v2666_v17  ;;  %p2985_p0 = pnand %p2984_p13, %p2980_p8 }
  0x4f   : > { %484 = vmatpush.bf16.msra.mxu0 %v2497_v34  ;;  %2195 = vmatpush.bf16.msra.mxu3 %v2674_v18  ;;  %v2672_v34 = vld [vmem:[#allocation9 + $0x60] sm:$0xff] }
  0x50   : > { %533 = vmatpush.bf16.msra.mxu1 %v2501_v35 }
  0x52   : > { %2147 = vmatpush.bf16.msra.mxu2 %v2665_v26 }
  0x53   : > { %485 = vmatpush.bf16.msra.mxu0 %v2489_v40  ;;  %2196 = vmatpush.bf16.msra.mxu3 %v2673_v29 }
  0x54   : > { %534 = vmatpush.bf16.msra.mxu1 %v2493_v41 }
  0x56   : > { %2148 = vmatpush.bf16.msra.mxu2 %v2664_v33 }
  0x57   : > { %486 = vmatpush.bf16.msra.mxu0 %v2481_v46  ;;  %2197 = vmatpush.bf16.msra.mxu3 %v2672_v34 }
  0x58   : > { %535 = vmatpush.bf16.msra.mxu1 %v2485_v49 }
  0x5a   : > { %487 = vmatmul.bf16.vlgmr.msra.gmra.mxu0 %v369_v50  ;;  %2149 = vmatpush.bf16.msra.mxu2 %v2663_v44 }
  0x5b   : > { %536 = vmatmul.bf16.vlgmr.msra.gmra.mxu1 %v369_v50  ;;  %2198 = vmatpush.bf16.msra.mxu3 %v2671_v45 }
  0x5e   : > { %2150 = vmatpush.bf16.msra.mxu2 %v2662_v52 }
  0x6a   : > { %492 = vmatmul.bf16.gmra.mxu0 %v370_v53 }
  0x6b   : > { %541 = vmatmul.bf16.gmra.mxu1 %v370_v53 }
  0x7a   : > { %497 = vmatmul.bf16.gmra.mxu0 %v371_v56 }
  0x7b   : > { %546 = vmatmul.bf16.gmra.mxu1 %v371_v56  ;;  %v2670_v56 = vld [vmem:[#allocation9 + $0x50] sm:$0xff] }
  0x7c   : > { %2199 = vmatpush.bf16.msra.mxu3 %v2670_v56 }
  0x80   : > { %2200 = vmatpush.bf16.msra.mxu3 %v2669_v2 }
  0x8a   : > { %502 = vmatmul.bf16.gmra.mxu0 %v372_v59 }
  0x8b   : > { %551 = vmatmul.bf16.gmra.mxu1 %v372_v59 }
  0x9a   : > { %507 = vmatmul.bf16.gmra.mxu0 %v373_v62 }
  0x9b   : > { %556 = vmatmul.bf16.gmra.mxu1 %v373_v62 }
  0xaa   : > { %512 = vmatmul.bf16.gmra.mxu0 %v374_v1 }
  0xab   : > { %561 = vmatmul.bf16.gmra.mxu1 %v374_v1  ;;  %v2661_v1 = vld [vmem:[#allocation9 + $0x8] sm:$0xff] }
  0xac   : > { %2151 = vmatpush.bf16.msra.mxu2 %v2661_v1 }
  0xba   : > { %517 = vmatmul.bf16.gmra.mxu0 %v375_v4 }
  0xbb   : > { %566 = vmatmul.bf16.gmra.mxu1 %v375_v4 }
  0xca   : > { %522 = vmatmul.bf16.gmra.mxu0 %v376_v7 }
  0xcb   : > { %571 = vmatmul.bf16.gmra.mxu1 %v376_v7 }
  0xd7   : > { %v488_v10 = vpop.f32.mrf.mxu0 }
  0xd8   : > { %v537_v12 = vpop.f32.mrf.mxu1  ;;  %v3256_v15 = vadd.f32 %v488_v10, %v3251_v9 }
  0xd9   : > { %v3259_v16 = vadd.f32 %v537_v12, %v3253_v11 }
  0xda   : > { %v3262_v19 = vmul.f32 0.70710677, %v3256_v15 }
  0xdb   : > { %v3265_v21 = vmul.f32 0.70710677, %v3259_v16 }
  0xdc   : > { %v641_v25 = vmul.f32 %v3262_v19, %v3262_v19 }
  0xdd   : > { %v681_v27 = vmul.f32 %v3265_v21, %v3265_v21 }
  0xde   : > { %v3283_v31 = vmin.f32 %v641_v25, 16.0  ;;  %v2668_v25 = vld [vmem:[#allocation9 + $0x40] sm:$0xff] }
  0xdf   : > { %v490_v20 = vpop.f32.mrf.mxu0  ;;  %v3285_v35 = vmin.f32 %v681_v27, 16.0  ;;  %2201 = vmatpush.bf16.msra.mxu3 %v2668_v25  ;;  %v3385_v25 = vmul.f32 0.5, %v3256_v15 }
  0xe0   : > { %v3268_v22 = vadd.f32 %v490_v20, %v3251_v9  ;;  %v539_v23 = vpop.f32.mrf.mxu1  ;;  %v643_v40 = vmul.f32 2.1237322e-06, %v3283_v31  ;;  %v654_v48 = vmul.f32 3.8918573e-05, %v3283_v31 }
  0xe1   : > { %v3271_v24 = vadd.f32 %v539_v23, %v3253_v11  ;;  %v683_v42 = vmul.f32 2.1237322e-06, %v3285_v35  ;;  %v2660_v23 = vld [vmem:[#allocation9] sm:$0xff] }
  0xe2   : > { %v3278_v28 = vmul.f32 0.70710677, %v3268_v22  ;;  %v644_v49 = vadd.f32 0.00028619796, %v643_v40  ;;  %v655_v3 = vadd.f32 0.001143296, %v654_v48  ;;  %2152 = vmatpush.bf16.msra.mxu2 %v2660_v23 }
  0xe3   : > { %v3281_v30 = vmul.f32 0.70710677, %v3271_v24  ;;  %v684_v53 = vadd.f32 0.00028619796, %v683_v42 }
  0xe4   : > { %v721_v36 = vmul.f32 %v3278_v28, %v3278_v28  ;;  %v645_v61 = vmul.f32 %v644_v49, %v3283_v31  ;;  %v656_v26 = vmul.f32 %v655_v3, %v3283_v31 }
  0xe5   : > { %v761_v38 = vmul.f32 %v3281_v30, %v3281_v30  ;;  %v685_v63 = vmul.f32 %v684_v53, %v3285_v35 }
  0xe6   : > { %v3299_v43 = vmin.f32 %v721_v36, 16.0  ;;  %v646_v8 = vadd.f32 0.0036580483, %v645_v61  ;;  %v657_v44 = vadd.f32 0.014752088, %v656_v26 }
  0xe7   : > { %v493_v32 = vpop.f32.mrf.mxu0  ;;  %v3301_v46 = vmin.f32 %v761_v38, 16.0  ;;  %v686_v14 = vadd.f32 0.0036580483, %v685_v63 }
  0xe8   : > { %v542_v37 = vpop.f32.mrf.mxu1  ;;  %v3292_v39 = vadd.f32 %v493_v32, %v3251_v9  ;;  %v723_v54 = vmul.f32 2.1237322e-06, %v3299_v43  ;;  %v658_v3 = vmul.f32 %v657_v44, %v3283_v31 }
  0xe9   : > { %v3296_v41 = vadd.f32 %v542_v37, %v3253_v11  ;;  %v763_v57 = vmul.f32 2.1237322e-06, %v3301_v46  ;;  %v647_v37 = vmul.f32 %v646_v8, %v3283_v31  ;;  %v687_v40 = vmul.f32 %v686_v14, %v3285_v35 }
  0xea   : > { %v3304_v47 = vmul.f32 0.70710677, %v3292_v39  ;;  %v724_v0 = vadd.f32 0.00028619796, %v723_v54 }
  0xeb   : > { %v3308_v50 = vmul.f32 0.70710677, %v3296_v41  ;;  %v764_v4 = vadd.f32 0.00028619796, %v763_v57 }
  0xec   : > { %v801_v58 = vmul.f32 %v3304_v47, %v3304_v47  ;;  %v725_v27 = vmul.f32 %v724_v0, %v3299_v43 }
  0xed   : > { %v841_v62 = vmul.f32 %v3308_v50, %v3308_v50  ;;  %v765_v29 = vmul.f32 %v764_v4, %v3301_v46 }
  0xee   : > { %v3324_v5 = vmin.f32 %v801_v58, 16.0  ;;  %v726_v45 = vadd.f32 0.0036580483, %v725_v27  ;;  %v688_v58 = vadd.f32 0.05243302, %v687_v40 }
  0xef   : > { %v495_v51 = vpop.f32.mrf.mxu0  ;;  %v3332_v10 = vmin.f32 %v841_v62, 16.0  ;;  %v766_v48 = vadd.f32 0.0036580483, %v765_v29  ;;  %v659_v40 = vadd.f32 0.112945676, %v658_v3 }
  0xf0   : > { %v544_v55 = vpop.f32.mrf.mxu1  ;;  %v3315_v59 = vadd.f32 %v495_v51, %v3251_v9  ;;  %v803_v32 = vmul.f32 2.1237322e-06, %v3324_v5  ;;  %v727_v0 = vmul.f32 %v726_v45, %v3299_v43  ;;  %v689_v26 = vmul.f32 %v688_v58, %v3285_v35 }
  0xf1   : > { %v3318_v60 = vadd.f32 %v544_v55, %v3253_v11  ;;  %v843_v38 = vmul.f32 2.1237322e-06, %v3332_v10  ;;  %v648_v55 = vadd.f32 0.05243302, %v647_v37  ;;  %v767_v4 = vmul.f32 %v766_v48, %v3301_v46 }
  0xf2   : > { %v3327_v6 = vmul.f32 0.70710677, %v3315_v59  ;;  %v804_v49 = vadd.f32 0.00028619796, %v803_v32  ;;  %v3393_v32 = vmul.f32 0.5, %v3259_v16  ;;  %v3396_v37 = vmul.f32 0.5, %v3268_v22 }
  0xf3   : > { %v3330_v7 = vmul.f32 0.70710677, %v3318_v60  ;;  %v844_v56 = vadd.f32 0.00028619796, %v843_v38  ;;  %v649_v14 = vmul.f32 %v648_v55, %v3283_v31  ;;  %v728_v44 = vadd.f32 0.05243302, %v727_v0 }
  0xf4   : > { %v881_v12 = vmul.f32 %v3327_v6, %v3327_v6  ;;  %v805_v1 = vmul.f32 %v804_v49, %v3324_v5  ;;  %v768_v45 = vadd.f32 0.05243302, %v767_v4  ;;  %v690_v16 = vadd.f32 0.18741608, %v689_v26 }
  0xf5   : > { %v921_v17 = vmul.f32 %v3330_v7, %v3330_v7  ;;  %v650_v49 = vadd.f32 0.18741608, %v649_v14  ;;  %v729_v0 = vmul.f32 %v728_v44, %v3299_v43 }
  0xf6   : > { %v3345_v33 = vmin.f32 %v881_v12, 16.0  ;;  %v806_v38 = vadd.f32 0.0036580483, %v805_v1  ;;  %v769_v1 = vmul.f32 %v768_v45, %v3301_v46  ;;  %v691_v26 = vmul.f32 %v690_v16, %v3285_v35 }
  0xf7   : > { %v498_v13 = vpop.f32.mrf.mxu0  ;;  %v3347_v34 = vmin.f32 %v921_v17, 16.0  ;;  %v845_v17 = vmul.f32 %v844_v56, %v3332_v10 }
  0xf8   : > { %v3339_v18 = vadd.f32 %v498_v13, %v3251_v9  ;;  %v547_v20 = vpop.f32.mrf.mxu1  ;;  %v883_v51 = vmul.f32 2.1237322e-06, %v3345_v33  ;;  %v807_v58 = vmul.f32 %v806_v38, %v3324_v5 }
  0xf9   : > { %v3350_v36 = vadd.f32 %v547_v20, %v3253_v11  ;;  %v923_v52 = vmul.f32 2.1237322e-06, %v3347_v34 }
  0xfa   : > { %v3356_v42 = vmul.f32 0.70710677, %v3339_v18  ;;  %v884_v8 = vadd.f32 0.00028619796, %v883_v51  ;;  %v846_v51 = vadd.f32 0.0036580483, %v845_v17 }
  0xfb   : > { %v3363_v54 = vmul.f32 0.70710677, %v3350_v36  ;;  %v924_v12 = vadd.f32 0.00028619796, %v923_v52 }
  0xfc   : > { %v961_v53 = vmul.f32 %v3356_v42, %v3356_v42  ;;  %v885_v15 = vmul.f32 %v884_v8, %v3345_v33 }
  0xfd   : > { %v1001_v62 = vmul.f32 %v3363_v54, %v3363_v54  ;;  %v925_v48 = vmul.f32 %v924_v12, %v3347_v34  ;;  %v3416_v12 = vmul.f32 0.5, %v3292_v39 }
  0xfe   : > { %v3365_v61 = vmin.f32 %v961_v53, 16.0  ;;  %v886_v3 = vadd.f32 0.0036580483, %v885_v15  ;;  %v730_v15 = vadd.f32 0.18741608, %v729_v0 }
  0xff   : > { %v500_v57 = vpop.f32.mrf.mxu0  ;;  %v3376_v13 = vmin.f32 %v1001_v62, 16.0  ;;  %v926_v4 = vadd.f32 0.0036580483, %v925_v48  ;;  %4673 = vst [vmem:[#allocation18_spill] sm:$0xff] %v3416_v12  ;;  %v770_v48 = vadd.f32 0.18741608, %v769_v1 }
 0x100   : > { %v549_v63 = vpop.f32.mrf.mxu1  ;;  %v3372_v2 = vadd.f32 %v500_v57, %v3251_v9  ;;  %v963_v20 = vmul.f32 2.1237322e-06, %v3365_v61  ;;  %v3406_v57 = vmul.f32 0.5, %v3271_v24  ;;  %v847_v24 = vmul.f32 %v846_v51, %v3332_v10 }
 0x101   : > { %4671 = vst [vmem:[#allocation16_spill] sm:$0xff] %v3376_v13  ;;  %v1003_v27 = vmul.f32 2.1237322e-06, %v3376_v13  ;;  %v3390_v29 = vadd.f32 %v549_v63, %v3253_v11  ;;  %v660_v63 = vmul.f32 %v659_v40, %v3283_v31  ;;  %v808_v40 = vadd.f32 0.05243302, %v807_v58 }
 0x102   : > { %v3382_v23 = vmul.f32 0.70710677, %v3372_v2  ;;  %v964_v52 = vadd.f32 0.00028619796, %v963_v20  ;;  %v651_v20 = vmul.f32 %v650_v49, %v3283_v31  ;;  %v887_v51 = vmul.f32 %v886_v3, %v3345_v33 }
 0x103   : > { %v1004_v56 = vadd.f32 0.00028619796, %v1003_v27  ;;  %v3403_v22 = vmul.f32 0.70710677, %v3390_v29  ;;  %v661_v45 = vadd.f32 0.4994258, %v660_v63  ;;  %v927_v49 = vmul.f32 %v926_v4, %v3347_v34 }
 0x104   : > { %v1041_v53 = vmul.f32 %v3382_v23, %v3382_v23  ;;  %v965_v14 = vmul.f32 %v964_v52, %v3365_v61  ;;  %v848_v52 = vadd.f32 0.05243302, %v847_v24  ;;  %v652_v16 = vadd.f32 1.1283791, %v651_v20 }
 0x105   : > { %4672 = vst [vmem:[#allocation17_spill] sm:$0xff] %v3403_v22  ;;  %v1005_v27 = vmul.f32 %v1004_v56, %v3376_v13  ;;  %v1081_v38 = vmul.f32 %v3403_v22, %v3403_v22  ;;  %v3437_v56 = vmul.f32 0.5, %v3296_v41  ;;  %v662_v3 = vmul.f32 %v661_v45, %v3283_v31 }
 0x106   : > { %v3420_v17 = vmin.f32 %v1041_v53, 16.0  ;;  %v966_v53 = vadd.f32 0.0036580483, %v965_v14  ;;  %v692_v4 = vadd.f32 1.1283791, %v691_v26  ;;  %v731_v24 = vmul.f32 %v730_v15, %v3299_v43 }
 0x107   : > { %v503_v55 = vpop.f32.mrf.mxu0  ;;  %4675 = vst [vmem:[#allocation20_spill] sm:$0xff] %v3437_v56  ;;  %v1006_v58 = vadd.f32 0.0036580483, %v1005_v27  ;;  %v3439_v12 = vmin.f32 %v1081_v38, 16.0  ;;  %v888_v14 = vadd.f32 0.05243302, %v887_v51  ;;  %v771_v20 = vmul.f32 %v770_v48, %v3301_v46 }
 0x108   : > { %v3410_v62 = vadd.f32 %v503_v55, %v3251_v9  ;;  %v552_v8 = vpop.f32.mrf.mxu1  ;;  %v1043_v55 = vmul.f32 2.1237322e-06, %v3420_v17  ;;  %v928_v41 = vadd.f32 0.05243302, %v927_v49  ;;  %v849_v27 = vmul.f32 %v848_v52, %v3332_v10 }
 0x109   : > { %v3431_v39 = vadd.f32 %v552_v8, %v3253_v11  ;;  %v809_v8 = vmul.f32 %v808_v40, %v3324_v5  ;;  %v967_v38 = vmul.f32 %v966_v53, %v3365_v61  ;;  %v3453_v56 = vmul.f32 %v652_v16, %v3262_v19 }
 0x10a   : > { %v3428_v44 = vmul.f32 0.70710677, %v3410_v62  ;;  %v1044_v40 = vadd.f32 0.00028619796, %v1043_v55  ;;  %v1083_v22 = vmul.f32 2.1237322e-06, %v3439_v12  ;;  %v889_v19 = vmul.f32 %v888_v14, %v3345_v33 }
 0x10b   : > { %v3445_v0 = vmul.f32 0.70710677, %v3431_v39  ;;  %v810_v26 = vadd.f32 0.18741608, %v809_v8  ;;  %v3464_v48 = vadd.f32 1.0, %v662_v3  ;;  %v3467_v49 = vmul.f32 0.5, %v3315_v59 }
 0x10c   : > { %4674 = vst [vmem:[#allocation19_spill] sm:$0xff] %v3428_v44  ;;  %v1121_v63 = vmul.f32 %v3428_v44, %v3428_v44  ;;  %v1007_v44 = vmul.f32 %v1006_v58, %v3376_v13  ;;  %v732_v51 = vadd.f32 1.1283791, %v731_v24  ;;  %v929_v52 = vmul.f32 %v928_v41, %v3347_v34 }
 0x10d   : > { %v1161_v15 = vmul.f32 %v3445_v0, %v3445_v0  ;;  %4676 = vst [vmem:[#allocation21_spill] sm:$0xff] %v3467_v49  ;;  %v772_v53 = vadd.f32 1.1283791, %v771_v20  ;;  %v850_v55 = vadd.f32 0.18741608, %v849_v27  ;;  %v1045_v58 = vmul.f32 %v1044_v40, %v3420_v17 }
 0x10e   : > { %v3460_v45 = vmin.f32 %v1121_v63, 16.0  ;;  %v968_v16 = vadd.f32 0.05243302, %v967_v38  ;;  %v3473_v63 = vmul.f32 %v692_v4, %v3265_v21  ;;  %v1084_v3 = vadd.f32 0.00028619796, %v1083_v22 }
 0x10f   : > { %v505_v1 = vpop.f32.mrf.mxu0  ;;  %v811_v59 = vmul.f32 %v810_v26, %v3324_v5  ;;  %v3480_v49 = vmin.f32 %v1161_v15, 16.0  ;;  %2777 = vrcp.f32 %v3464_v48  ;;  %v890_v41 = vadd.f32 0.18741608, %v889_v19 }
 0x110   : > { %v3458_v31 = vadd.f32 %v505_v1, %v3251_v9  ;;  %v554_v8 = vpop.f32.mrf.mxu1  ;;  %v1008_v1 = vadd.f32 0.05243302, %v1007_v44  ;;  %v1123_v14 = vmul.f32 2.1237322e-06, %v3460_v45  ;;  %v3484_v20 = vmul.f32 0.5, %v3318_v60 }
 0x111   : > { %v930_v27 = vadd.f32 0.18741608, %v929_v52  ;;  %v3487_v21 = vadd.f32 %v554_v8, %v3253_v11  ;;  %v851_v22 = vmul.f32 %v850_v55, %v3332_v10  ;;  %v3491_v44 = vmul.f32 0.5, %v3339_v18 }
 0x112   : > { %v3476_v24 = vmul.f32 0.70710677, %v3458_v31  ;;  %4677 = vst [vmem:[#allocation22_spill] sm:$0xff] %v3484_v20  ;;  %v969_v4 = vmul.f32 %v968_v16, %v3365_v61  ;;  %v1046_v38 = vadd.f32 0.0036580483, %v1045_v58  ;;  %v3495_v40 = vmul.f32 %v732_v51, %v3278_v28 }
 0x113   : > { %4678 = vst [vmem:[#allocation23_spill] sm:$0xff] %v3491_v44  ;;  %v1009_v26 = vmul.f32 %v1008_v1, %v3376_v13  ;;  %v1085_v60 = vmul.f32 %v1084_v3, %v3439_v12  ;;  %v3502_v19 = vmul.f32 %v772_v53, %v3281_v30  ;;  %v812_v52 = vadd.f32 1.1283791, %v811_v59 }
 0x114   : > { %v1201_v15 = vmul.f32 %v3476_v24, %v3476_v24  ;;  %v1124_v55 = vadd.f32 0.00028619796, %v1123_v14  ;;  %v1163_v18 = vmul.f32 2.1237322e-06, %v3480_v49  ;;  %v891_v16 = vmul.f32 %v890_v41, %v3345_v33 }
 0x115   : > { %v931_v28 = vmul.f32 %v930_v27, %v3347_v34  ;;  %v3508_v51 = vmul.f32 0.5, %v3350_v36  ;;  %v3511_v58 = vmul.f32 0.70710677, %v3487_v21  ;;  %v3513_v1 = vpop.eup %2777  ;;  %v852_v3 = vadd.f32 1.1283791, %v851_v22 }
 0x116   : > { %v970_v30 = vadd.f32 0.18741608, %v969_v4  ;;  %v1047_v53 = vmul.f32 %v1046_v38, %v3420_v17  ;;  %v734_v59 = vmul.f32 3.8918573e-05, %v3299_v43  ;;  %v1010_v14 = vadd.f32 0.18741608, %v1009_v26 }
 0x117   : > { %v508_v8 = vpop.f32.mrf.mxu0  ;;  %4679 = vst [vmem:[#allocation24_spill] sm:$0xff] %v3508_v51  ;;  %v1086_v44 = vadd.f32 0.0036580483, %v1085_v60  ;;  %v3517_v20 = vmin.f32 %v1201_v15, 16.0  ;;  %v3523_v36 = vmul.f32 %v812_v52, %v3304_v47  ;;  %v3526_v27 = vmul.f32 0.5, %v3372_v2 }
 0x118   : > { %v3520_v41 = vadd.f32 %v508_v8, %v3251_v9  ;;  %v1125_v22 = vmul.f32 %v1124_v55, %v3460_v45  ;;  %v1164_v4 = vadd.f32 0.00028619796, %v1163_v18  ;;  %v892_v51 = vadd.f32 1.1283791, %v891_v16 }
 0x119   : > { %4680 = vst [vmem:[#allocation25_spill] sm:$0xff] %v3523_v36  ;;  %v932_v38 = vadd.f32 1.1283791, %v931_v28  ;;  %v1241_v26 = vmul.f32 %v3511_v58, %v3511_v58  ;;  %v665_v60 = vmul.f32 %v3513_v1, %v3464_v48  ;;  %v3534_v15 = vmul.f32 %v852_v3, %v3308_v50 }
 0x11a   : > { %4681 = vst [vmem:[#allocation26_spill] sm:$0xff] %v3526_v27  ;;  %v971_v47 = vmul.f32 %v970_v30, %v3365_v61  ;;  %v1048_v52 = vadd.f32 0.05243302, %v1047_v53  ;;  %v3538_v2 = vmul.f32 0.5, %v3390_v29  ;;  %v1011_v55 = vmul.f32 %v1010_v14, %v3376_v13 }
 0x11b   : > { %4682 = vst [vmem:[#allocation27_spill] sm:$0xff] %v3534_v15  ;;  %v1087_v18 = vmul.f32 %v1086_v44, %v3439_v12  ;;  %v1203_v8 = vmul.f32 2.1237322e-06, %v3517_v20  ;;  %v3544_v16 = vmul.f32 0.70710677, %v3520_v41  ;;  %v3547_v28 = vmul.f32 0.5, %v3410_v62 }
 0x11c   : > { %4683 = vst [vmem:[#allocation28_spill] sm:$0xff] %v3538_v2  ;;  %v1126_v50 = vadd.f32 0.0036580483, %v1125_v22  ;;  %v3550_v3 = vmul.f32 0.5, %v3431_v39  ;;  %v1165_v30 = vmul.f32 %v1164_v4, %v3480_v49  ;;  %v3554_v29 = vmul.f32 %v892_v51, %v3327_v6  ;;  %v557_v22 = vpop.f32.mrf.mxu1 }
 0x11d   : > { %4684 = vst [vmem:[#allocation29_spill] sm:$0xff] %v3544_v16  ;;  %v3557_v53 = vmul.f32 %v932_v38, %v3330_v7  ;;  %v3559_v44 = vmin.f32 %v1241_v26, 16.0  ;;  %v666_v14 = vsub.f32 1.0, %v665_v60  ;;  %v972_v2 = vadd.f32 1.1283791, %v971_v47 }
 0x11e   : > { %4685 = vst [vmem:[#allocation30_spill] sm:$0xff] %v3547_v28  ;;  %v1049_v27 = vmul.f32 %v1048_v52, %v3420_v17  ;;  %v3563_v62 = vmul.f32 0.5, %v3458_v31  ;;  %v735_v39 = vadd.f32 0.001143296, %v734_v59  ;;  %v1088_v4 = vadd.f32 0.05243302, %v1087_v18 }
 0x11f   : > { %4686 = vst [vmem:[#allocation31_spill] sm:$0xff] %v3550_v3  ;;  %v3565_v3 = vadd.f32 1.1283791, %v1011_v55  ;;  %v1204_v28 = vadd.f32 0.00028619796, %v1203_v8  ;;  %v1281_v6 = vmul.f32 %v3544_v16, %v3544_v16  ;;  %v1127_v7 = vmul.f32 %v1126_v50, %v3460_v45 }
 0x120   : > { %4687 = vst [vmem:[#allocation32_spill] sm:$0xff] %v3554_v29  ;;  %v1166_v51 = vadd.f32 0.0036580483, %v1165_v30  ;;  %v736_v38 = vmul.f32 %v735_v39, %v3299_v43  ;;  %v694_v26 = vmul.f32 3.8918573e-05, %v3285_v35  ;;  %v3574_v31 = vadd.f32 %v557_v22, %v3253_v11 }
 0x121   : > { %4688 = vst [vmem:[#allocation33_spill] sm:$0xff] %v3557_v53  ;;  %v1243_v60 = vmul.f32 2.1237322e-06, %v3559_v44  ;;  %v667_v59 = vmul.f32 %v3513_v1, %v666_v14  ;;  %v774_v47 = vmul.f32 3.8918573e-05, %v3301_v46  ;;  %v3579_v52 = vmul.f32 %v972_v2, %v3356_v42 }
 0x122   : > { %4689 = vst [vmem:[#allocation34_spill] sm:$0xff] %v3563_v62  ;;  %v3582_v55 = vmul.f32 0.5, %v3487_v21  ;;  %v737_v18 = vadd.f32 0.014752088, %v736_v38  ;;  %v695_v8 = vadd.f32 0.001143296, %v694_v26  ;;  %v1089_v30 = vmul.f32 %v1088_v4, %v3439_v12 }
 0x123   : > { %4690 = vst [vmem:[#allocation35_spill] sm:$0xff] %v3579_v52  ;;  %v1050_v50 = vadd.f32 0.18741608, %v1049_v27  ;;  %v1205_v39 = vmul.f32 %v1204_v28, %v3517_v20  ;;  %v3586_v62 = vmin.f32 %v1281_v6, 16.0  ;;  %v1128_v22 = vadd.f32 0.05243302, %v1127_v7 }
 0x124   : > { %4691 = vst [vmem:[#allocation36_spill] sm:$0xff] %v3582_v55  ;;  %v738_v14 = vmul.f32 %v737_v18, %v3299_v43  ;;  %v696_v53 = vmul.f32 %v695_v8, %v3285_v35  ;;  %v775_v13 = vadd.f32 0.001143296, %v774_v47  ;;  %v1167_v42 = vmul.f32 %v1166_v51, %v3480_v49 }
 0x125   : > { %v1244_v2 = vadd.f32 0.00028619796, %v1243_v60  ;;  %v3592_v21 = vmul.f32 0.70710677, %v3574_v31  ;;  %v668_v27 = vadd.f32 %v3513_v1, %v667_v59  ;;  %vm670_vm0 = vweird.f32 %v3513_v1 }
 0x126   : > { %v739_v4 = vadd.f32 0.112945676, %v738_v14  ;;  %v697_v28 = vadd.f32 0.014752088, %v696_v53  ;;  %v776_v6 = vmul.f32 %v775_v13, %v3301_v46  ;;  %v1206_v7 = vadd.f32 0.0036580483, %v1205_v39 }
 0x127   : > { %4692 = vst [vmem:[#allocation37_spill] sm:$0xff] %v3592_v21  ;;  %v1283_v38 = vmul.f32 2.1237322e-06, %v3586_v62  ;;  %vm669_vm1 = vweird.f32 %v3464_v48  ;;  %v675_v26 = vand.u32 2147483648, %v3464_v48  ;;  %v673_v51 = vand.u32 2147483647, %v3464_v48 }
 0x128   : > { %v740_v60 = vmul.f32 %v739_v4, %v3299_v43  ;;  %v698_v47 = vmul.f32 %v697_v28, %v3285_v35  ;;  %v777_v59 = vadd.f32 0.014752088, %v776_v6  ;;  %v1168_v18 = vadd.f32 0.05243302, %v1167_v42  ;;  %vm3608_vm2 = vmor %vm669_vm1, %vm670_vm0 }
 0x129   : > { %v1245_v8 = vmul.f32 %v1244_v2, %v3559_v44  ;;  %v1321_v13 = vmul.f32 %v3592_v21, %v3592_v21  ;;  %v814_v39 = vmul.f32 3.8918573e-05, %v3324_v5  ;;  %v672_v48 = vsel %vm3608_vm2, %v3513_v1, %v668_v27 }
 0x12a   : > { %v741_v14 = vadd.f32 0.4994258, %v740_v60  ;;  %v699_v4 = vadd.f32 0.112945676, %v698_v47  ;;  %v778_v42 = vmul.f32 %v777_v59, %v3301_v46  ;;  %v1207_v2 = vmul.f32 %v1206_v7, %v3517_v20 }
 0x12b   : > { %v1284_v28 = vadd.f32 0.00028619796, %v1283_v38  ;;  %v676_v6 = vor.u32 1.1754944e-38, %v675_v26  ;;  %v815_v55 = vadd.f32 0.001143296, %v814_v39  ;;  %vm674_vm3 = vcmp.eq.f32.partialorder %v673_v51, 8.507059e+37 }
 0x12c   : > { %v742_v52 = vmul.f32 %v741_v14, %v3299_v43  ;;  %v700_v15 = vmul.f32 %v699_v4, %v3285_v35  ;;  %v779_v21 = vadd.f32 0.112945676, %v778_v42  ;;  %v1090_v29 = vadd.f32 0.18741608, %v1089_v30 }
 0x12d   : > { %v1246_v36 = vadd.f32 0.0036580483, %v1245_v8  ;;  %v677_v16 = vsel %vm674_vm3, %v676_v6, %v672_v48  ;;  %v816_v1 = vmul.f32 %v815_v55, %v3324_v5  ;;  %v3621_v27 = vmin.f32 %v1321_v13, 16.0 }
 0x12e   : > { %v3623_v60 = vadd.f32 1.0, %v742_v52  ;;  %v701_v47 = vadd.f32 0.4994258, %v700_v15  ;;  %v780_v7 = vmul.f32 %v779_v21, %v3301_v46  ;;  %v1051_v38 = vmul.f32 %v1050_v50, %v3420_v17 }
 0x12f   : > { %v1129_v26 = vmul.f32 %v1128_v22, %v3460_v45  ;;  %v1169_v43 = vmul.f32 %v1168_v18, %v3480_v49  ;;  %v817_v51 = vadd.f32 0.014752088, %v816_v1  ;;  %v1208_v59 = vadd.f32 0.05243302, %v1207_v2 }
 0x130   : > { %v1285_v30 = vmul.f32 %v1284_v28, %v3586_v62  ;;  %v678_v8 = vmul.f32 %v677_v16, %v3453_v56  ;;  %2779 = vrcp.f32 %v3623_v60  ;;  %v1247_v52 = vmul.f32 %v1246_v36, %v3559_v44 }
 0x131   : > { %v702_v15 = vmul.f32 %v701_v47, %v3285_v35  ;;  %v781_v55 = vadd.f32 0.4994258, %v780_v7  ;;  %v818_v21 = vmul.f32 %v817_v51, %v3324_v5  ;;  %v3637_v50 = vmul.f32 %v3565_v3, %v3363_v54  ;;  %v510_v7 = vpop.f32.mrf.mxu0 }
 0x132   : > { %v1091_v22 = vmul.f32 %v1090_v29, %v3439_v12  ;;  %v1323_v18 = vmul.f32 2.1237322e-06, %v3621_v27  ;;  %v894_v13 = vmul.f32 3.8918573e-05, %v3345_v33  ;;  %v1130_v56 = vadd.f32 0.18741608, %v1129_v26 }
 0x133   : > { %v1170_v16 = vadd.f32 0.18741608, %v1169_v43  ;;  %v3642_v53 = vadd.f32 1.0, %v702_v15  ;;  %v782_v36 = vmul.f32 %v781_v55, %v3301_v46  ;;  %v3645_v35 = vadd.f32 1.1283791, %v1051_v38 }
 0x134   : > { %v3648_v39 = vmul.f32 0.5, %v3520_v41  ;;  %v1286_v48 = vadd.f32 0.0036580483, %v1285_v30  ;;  %v2542_v54 = vclamps-f32 %v678_v8, 1.0  ;;  %v1209_v3 = vmul.f32 %v1208_v59, %v3517_v20 }
 0x135   : > { %v1248_v29 = vadd.f32 0.05243302, %v1247_v52  ;;  %2781 = vrcp.f32 %v3642_v53  ;;  %v819_v14 = vadd.f32 0.112945676, %v818_v21  ;;  %v3653_v42 = vmul.f32 0.5, %v3574_v31 }
 0x136   : > { %4695 = vst [vmem:[#allocation38_spill] sm:$0xff] %v3648_v39  ;;  %v2780_v4 = vpop.eup %2779  ;;  %v1324_v2 = vadd.f32 0.00028619796, %v1323_v18  ;;  %v3655_v28 = vadd.f32 1.0, %v782_v36  ;;  %v895_v46 = vadd.f32 0.001143296, %v894_v13  ;;  %v3660_v41 = vmul.f32 %v1130_v56, %v3460_v45  ;;  %v559_v36 = vpop.f32.mrf.mxu1 }
 0x137   : > { %4696 = vst [vmem:[#allocation39_spill] sm:$0xff] %v3653_v42  ;;  %v3657_v6 = vadd.f32 1.1283791, %v1091_v22  ;;  %v3663_v1 = vmul.f32 %v1170_v16, %v3480_v49  ;;  %v745_v47 = vmul.f32 %v2780_v4, %v3623_v60  ;;  %v3667_v38 = vmul.f32 %v1286_v48, %v3586_v62 }
 0x138   : > { %v1921_v31 = vadd.f32 1.0, %v2542_v54  ;;  %2783 = vrcp.f32 %v3655_v28  ;;  %v854_v26 = vmul.f32 3.8918573e-05, %v3332_v10  ;;  %v3671_v43 = vadd.f32 0.18741608, %v1209_v3 }
 0x139   : > { %v746_v51 = vsub.f32 1.0, %v745_v47  ;;  %v753_v59 = vand.u32 2147483647, %v3623_v60  ;;  %v820_v30 = vmul.f32 %v819_v14, %v3324_v5  ;;  %v3676_v8 = vmul.f32 %v1248_v29, %v3559_v44 }
 0x13a   : > { %v3679_v52 = vmul.f32 %v1324_v2, %v3621_v27  ;;  %v755_v15 = vand.u32 2147483648, %v3623_v60  ;;  %v896_v55 = vmul.f32 %v895_v46, %v3345_v33  ;;  %vm750_vm4 = vweird.f32 %v2780_v4 }
 0x13b   : > { %v2782_v21 = vpop.eup %2781  ;;  %v747_v22 = vmul.f32 %v2780_v4, %v746_v51  ;;  %v3684_v18 = vadd.f32 %v510_v7, %v3251_v9  ;;  %v821_v13 = vadd.f32 0.4994258, %v820_v30  ;;  %vm749_vm5 = vweird.f32 %v3623_v60 }
 0x13c   : > { %v3688_v56 = vmul.f32 %v1921_v31, %v3385_v25  ;;  %v705_v16 = vmul.f32 %v2782_v21, %v3642_v53  ;;  %v855_v48 = vadd.f32 0.001143296, %v854_v26  ;;  %vm754_vm6 = vcmp.eq.f32.partialorder %v753_v59, 8.507059e+37  ;;  %vm751_vm7 = vmor %vm749_vm5, %vm750_vm4 }
 0x13d   : > { %v748_v54 = vadd.f32 %v2780_v4, %v747_v22  ;;  %v713_v3 = vand.u32 2147483647, %v3642_v53  ;;  %v715_v29 = vand.u32 2147483648, %v3642_v53  ;;  %v756_v2 = vor.u32 1.1754944e-38, %v755_v15 }
 0x13e   : > { %v2784_v14 = vpop.eup %2783  ;;  %v706_v46 = vsub.f32 1.0, %v705_v16  ;;  %v822_v47 = vmul.f32 %v821_v13, %v3324_v5  ;;  %v897_v60 = vadd.f32 0.014752088, %v896_v55  ;;  %v3696_v31 = vmul.f32 0.70710677, %v3684_v18  ;;  %v513_v55 = vpop.f32.mrf.mxu0 }
 0x13f   : > { %v752_v7 = vsel %vm751_vm7, %v2780_v4, %v748_v54  ;;  %v785_v25 = vmul.f32 %v2784_v14, %v3655_v28  ;;  %v3699_v26 = vadd.f32 %v559_v36, %v3253_v11  ;;  %vm709_vm8 = vweird.f32 %v3642_v53 }
 0x140   : > { %v757_v51 = vsel %vm754_vm6, %v756_v2, %v752_v7  ;;  %v707_v59 = vmul.f32 %v2782_v21, %v706_v46  ;;  %vm710_vm9 = vweird.f32 %v2782_v21  ;;  %vm3703_vm10 = vcmp.eq.f32.partialorder %v713_v3, 8.507059e+37 }
 0x141   : > { %v758_v30 = vmul.f32 %v757_v51, %v3495_v40  ;;  %v716_v5 = vor.u32 1.1754944e-38, %v715_v29  ;;  %v786_v4 = vsub.f32 1.0, %v785_v25  ;;  %v793_v13 = vand.u32 2147483647, %v3655_v28  ;;  %vm711_vm11 = vmor %vm709_vm8, %vm710_vm9 }
 0x142   : > { %v708_v22 = vadd.f32 %v2782_v21, %v707_v59  ;;  %v795_v16 = vand.u32 2147483648, %v3655_v28  ;;  %v3709_v36 = vadd.f32 1.0, %v822_v47  ;;  %vm790_vm12 = vweird.f32 %v2784_v14 }
 0x143   : > { %v2544_v54 = vclamps-f32 %v758_v30, 1.0  ;;  %v787_v53 = vmul.f32 %v2784_v14, %v786_v4  ;;  %v1361_v40 = vmul.f32 %v3696_v31, %v3696_v31  ;;  %vm789_vm13 = vweird.f32 %v3655_v28 }
 0x144   : > { %v712_v3 = vsel %vm711_vm11, %v2782_v21, %v708_v22  ;;  %v3715_v29 = vadd.f32 %v513_v55, %v3251_v9  ;;  %2785 = vrcp.f32 %v3709_v36  ;;  %v3721_v7 = vmul.f32 0.70710677, %v3699_v26  ;;  %vm791_vm14 = vmor %vm789_vm13, %vm790_vm12 }
 0x145   : > { %v1923_v2 = vadd.f32 1.0, %v2544_v54  ;;  %v717_v46 = vsel %vm3703_vm10, %v716_v5, %v712_v3  ;;  %v788_v47 = vadd.f32 %v2784_v14, %v787_v53  ;;  %v796_v51 = vor.u32 1.1754944e-38, %v795_v16 }
 0x146   : > { %v718_v25 = vmul.f32 %v717_v46, %v3473_v63  ;;  %v898_v21 = vmul.f32 %v897_v60, %v3345_v33  ;;  %v856_v28 = vmul.f32 %v855_v48, %v3332_v10  ;;  %vm794_vm15 = vcmp.eq.f32.partialorder %v793_v13, 8.507059e+37 }
 0x147   : > { %v1955_v59 = vmul.f32 %v1923_v2, %v3396_v37  ;;  %v792_v30 = vsel %vm791_vm14, %v2784_v14, %v788_v47  ;;  %v3727_v4 = vmin.f32 %v1361_v40, 16.0  ;;  %v1288_v15 = vadd.f32 0.05243302, %v3667_v38 }
 0x148   : > { %v2543_v5 = vclamps-f32 %v718_v25, 1.0  ;;  %v797_v55 = vsel %vm794_vm15, %v796_v51, %v792_v30  ;;  %v3731_v22 = vmul.f32 0.70710677, %v3715_v29  ;;  %v1326_v63 = vadd.f32 0.0036580483, %v3679_v52 }
 0x149   : > { %v2001_v16 = vpack.c.bf16 %v1955_v59, %v3688_v56  ;;  %v798_v60 = vmul.f32 %v797_v55, %v3502_v19  ;;  %v1401_v37 = vmul.f32 %v3721_v7, %v3721_v7  ;;  %v3742_v14 = vmul.f32 %v3645_v35, %v3382_v23 }
 0x14a   : > { %v3738_v48 = vpop.eup %2785  ;;  %v1132_v38 = vadd.f32 1.1283791, %v3660_v41  ;;  %v899_v13 = vadd.f32 0.112945676, %v898_v21  ;;  %v857_v54 = vadd.f32 0.014752088, %v856_v28  ;;  %v1211_v3 = vmul.f32 %v3671_v43, %v3517_v20  ;;  %v562_v41 = vpop.f32.mrf.mxu1 }
 0x14b   : > { %2153 = vmatmul.bf16.vlgmr.msra.gmra.mxu2 %v2001_v16  ;;  %v2545_v53 = vclamps-f32 %v798_v60, 1.0  ;;  %v1922_v52 = vadd.f32 1.0, %v2543_v5  ;;  %v1363_v56 = vmul.f32 2.1237322e-06, %v3727_v4  ;;  %v825_v19 = vmul.f32 %v3738_v48, %v3709_v36  ;;  %v4700_v60 = vld [vmem:[#allocation19_spill] sm:$0xff] }
 0x14c   : > { %v1172_v40 = vadd.f32 1.1283791, %v3663_v1  ;;  %v1289_v23 = vmul.f32 %v1288_v15, %v3586_v62  ;;  %v1441_v35 = vmul.f32 %v3731_v22, %v3731_v22  ;;  %v1250_v2 = vadd.f32 0.18741608, %v3676_v8  ;;  %v4699_v8 = vld [vmem:[#allocation17_spill] sm:$0xff] }
 0x14d   : > { %v1327_v46 = vmul.f32 %v1326_v63, %v3621_v27  ;;  %v1924_v47 = vadd.f32 1.0, %v2545_v53  ;;  %v3756_v25 = vmin.f32 %v1401_v37, 16.0  ;;  %v826_v51 = vsub.f32 1.0, %v825_v19 }
 0x14e   : > { %v900_v21 = vmul.f32 %v899_v13, %v3345_v33  ;;  %v858_v1 = vmul.f32 %v857_v54, %v3332_v10  ;;  %v934_v43 = vmul.f32 3.8918573e-05, %v3347_v34  ;;  %v1954_v28 = vmul.f32 %v1922_v52, %v3393_v32 }
 0x14f   : > { %v1956_v59 = vmul.f32 %v1924_v47, %v3406_v57  ;;  %v1364_v30 = vadd.f32 0.00028619796, %v1363_v56  ;;  %v3764_v15 = vadd.f32 %v562_v41, %v3253_v11  ;;  %v3768_v5 = vmul.f32 %v3657_v6, %v4699_v8 }
 0x150   : > { %v1212_v55 = vadd.f32 1.1283791, %v1211_v3  ;;  %v1290_v63 = vadd.f32 0.18741608, %v1289_v23  ;;  %v3770_v16 = vmin.f32 %v1441_v35, 16.0  ;;  %v3773_v37 = vmul.f32 %v1132_v38, %v4700_v60 }
 0x151   : > { %v1328_v13 = vadd.f32 0.05243302, %v1327_v46  ;;  %v2002_v54 = vpack.c.bf16 %v1956_v59, %v1954_v28  ;;  %v1403_v32 = vmul.f32 2.1237322e-06, %v3756_v25  ;;  %v3777_v57 = vmul.f32 %v1172_v40, %v3445_v0 }
 0x152   : > { %v1251_v53 = vmul.f32 %v1250_v2, %v3559_v44  ;;  %v827_v52 = vmul.f32 %v3738_v48, %v826_v51  ;;  %v901_v6 = vadd.f32 0.4994258, %v900_v21  ;;  %v1365_v56 = vmul.f32 %v1364_v30, %v3727_v4 }
 0x153   : > { %2202 = vmatmul.bf16.vlgmr.msra.gmra.mxu3 %v2002_v54  ;;  %v3783_v19 = vmul.f32 0.70710677, %v3764_v15  ;;  %v859_v38 = vadd.f32 0.112945676, %v858_v1  ;;  %v935_v3 = vadd.f32 0.001143296, %v934_v43  ;;  %v3786_v23 = vmul.f32 %v1212_v55, %v3476_v24 }
 0x154   : > { %v1291_v35 = vmul.f32 %v1290_v63, %v3586_v62  ;;  %v1443_v0 = vmul.f32 2.1237322e-06, %v3770_v16  ;;  %v902_v40 = vmul.f32 %v901_v6, %v3345_v33  ;;  %v1329_v41 = vmul.f32 %v1328_v13, %v3621_v27 }
 0x155   : > { %v1404_v2 = vadd.f32 0.00028619796, %v1403_v32  ;;  %vm830_vm0 = vweird.f32 %v3738_v48  ;;  %v860_v46 = vmul.f32 %v859_v38, %v3332_v10  ;;  %v828_v47 = vadd.f32 %v3738_v48, %v827_v52 }
 0x156   : > { %v3795_v51 = vadd.f32 1.0, %v902_v40  ;;  %v936_v24 = vmul.f32 %v935_v3, %v3347_v34  ;;  %v974_v21 = vmul.f32 3.8918573e-05, %v3365_v61  ;;  %v1366_v1 = vadd.f32 0.0036580483, %v1365_v56 }
 0x157   : > { %v1481_v43 = vmul.f32 %v3783_v19, %v3783_v19  ;;  %v835_v33 = vand.u32 2147483648, %v3709_v36  ;;  %v861_v28 = vadd.f32 0.4994258, %v860_v46  ;;  %v1444_v59 = vadd.f32 0.00028619796, %v1443_v0 }
 0x158   : > { %vm829_vm1 = vweird.f32 %v3709_v36  ;;  %v833_v30 = vand.u32 2147483647, %v3709_v36  ;;  %2787 = vrcp.f32 %v3795_v51  ;;  %v1252_v8 = vadd.f32 1.1283791, %v1251_v53 }
 0x159   : > { %v1330_v55 = vadd.f32 0.18741608, %v1329_v41  ;;  %v1405_v63 = vmul.f32 %v1404_v2, %v3756_v25  ;;  %vm3808_vm2 = vmor %vm829_vm1, %vm830_vm0  ;;  %v862_v13 = vmul.f32 %v861_v28, %v3332_v10  ;;  %v1292_v54 = vadd.f32 1.1283791, %v1291_v35 }
 0x15a   : > { %v832_v32 = vsel %vm3808_vm2, %v3738_v48, %v828_v47  ;;  %v937_v36 = vadd.f32 0.014752088, %v936_v24  ;;  %v975_v52 = vadd.f32 0.001143296, %v974_v21  ;;  %v1367_v53 = vmul.f32 %v1366_v1, %v3727_v4  ;;  %v4704_v21 = vld [vmem:[#allocation29_spill] sm:$0xff] }
 0x15b   : > { %v3817_v6 = vmin.f32 %v1481_v43, 16.0  ;;  %v836_v56 = vor.u32 1.1754944e-38, %v835_v33  ;;  %v3819_v38 = vadd.f32 1.0, %v862_v13  ;;  %v1445_v3 = vmul.f32 %v1444_v59, %v3770_v16 }
 0x15c   : > { %vm834_vm3 = vcmp.eq.f32.partialorder %v833_v30, 8.507059e+37  ;;  %v938_v0 = vmul.f32 %v937_v36, %v3347_v34  ;;  %v976_v10 = vmul.f32 %v975_v52, %v3365_v61  ;;  %v1331_v35 = vmul.f32 %v1330_v55, %v3621_v27  ;;  %v4706_v30 = vld [vmem:[#allocation25_spill] sm:$0xff] }
 0x15d   : > { %v1406_v40 = vadd.f32 0.0036580483, %v1405_v63  ;;  %v837_v48 = vsel %vm834_vm3, %v836_v56, %v832_v32  ;;  %2789 = vrcp.f32 %v3819_v38  ;;  %v3827_v2 = vmul.f32 %v1252_v8, %v3511_v58 }
 0x15e   : > { %v2788_v41 = vpop.eup %2787  ;;  %v939_v46 = vadd.f32 0.112945676, %v938_v0  ;;  %v977_v47 = vadd.f32 0.014752088, %v976_v10  ;;  %v1054_v24 = vmul.f32 3.8918573e-05, %v3420_v17  ;;  %v3831_v1 = vmul.f32 %v1292_v54, %v4704_v21  ;;  %v515_v21 = vpop.f32.mrf.mxu0 }
 0x15f   : > { %4703 = vst [vmem:[#allocation17_spill] sm:$0xff] %v3827_v2  ;;  %v1368_v43 = vadd.f32 0.05243302, %v1367_v53  ;;  %v1483_v33 = vmul.f32 2.1237322e-06, %v3817_v6  ;;  %v905_v28 = vmul.f32 %v2788_v41, %v3795_v51  ;;  %v838_v55 = vmul.f32 %v837_v48, %v4706_v30 }
 0x160   : > { %4705 = vst [vmem:[#allocation19_spill] sm:$0xff] %v3831_v1  ;;  %v1446_v59 = vadd.f32 0.0036580483, %v1445_v3  ;;  %v940_v63 = vmul.f32 %v939_v46, %v3347_v34  ;;  %v978_v58 = vmul.f32 %v977_v47, %v3365_v61  ;;  %v1332_v8 = vadd.f32 1.1283791, %v1331_v35 }
 0x161   : > { %v906_v60 = vsub.f32 1.0, %v905_v28  ;;  %v913_v13 = vand.u32 2147483647, %v3795_v51  ;;  %v915_v32 = vand.u32 2147483648, %v3795_v51  ;;  %v1407_v54 = vmul.f32 %v1406_v40, %v3756_v25  ;;  %v564_v40 = vpop.f32.mrf.mxu1 }
 0x162   : > { %v941_v36 = vadd.f32 0.4994258, %v940_v63  ;;  %v979_v52 = vadd.f32 0.112945676, %v978_v58  ;;  %v1055_v53 = vadd.f32 0.001143296, %v1054_v24  ;;  %v1369_v3 = vmul.f32 %v1368_v43, %v3727_v4 }
 0x163   : > { %v2790_v56 = vpop.eup %2789  ;;  %v1484_v0 = vadd.f32 0.00028619796, %v1483_v33  ;;  %v907_v10 = vmul.f32 %v2788_v41, %v906_v60  ;;  %vm910_vm4 = vweird.f32 %v2788_v41  ;;  %v1447_v48 = vmul.f32 %v1446_v59, %v3770_v16 }
 0x164   : > { %v2546_v46 = vclamps-f32 %v838_v55, 1.0  ;;  %v865_v35 = vmul.f32 %v2790_v56, %v3819_v38  ;;  %v942_v47 = vmul.f32 %v941_v36, %v3347_v34  ;;  %vm909_vm5 = vweird.f32 %v3795_v51 }
 0x165   : > { %v908_v28 = vadd.f32 %v2788_v41, %v907_v10  ;;  %vm914_vm6 = vcmp.eq.f32.partialorder %v913_v13, 8.507059e+37  ;;  %v980_v24 = vmul.f32 %v979_v52, %v3365_v61  ;;  %vm911_vm7 = vmor %vm909_vm5, %vm910_vm4  ;;  %v916_v43 = vor.u32 1.1754944e-38, %v915_v32  ;;  %v4707_v32 = vld [vmem:[#allocation32_spill] sm:$0xff] }
 0x166   : > { %v866_v33 = vsub.f32 1.0, %v865_v35  ;;  %v3847_v30 = vadd.f32 1.0, %v942_v47  ;;  %v1056_v59 = vmul.f32 %v1055_v53, %v3420_v17  ;;  %vm870_vm8 = vweird.f32 %v2790_v56  ;;  %v4708_v47 = vld [vmem:[#allocation37_spill] sm:$0xff] }
 0x167   : > { %v912_v55 = vsel %vm911_vm7, %v2788_v41, %v908_v28  ;;  %v3851_v63 = vadd.f32 %v515_v21, %v3251_v9  ;;  %v981_v34 = vadd.f32 0.4994258, %v980_v24  ;;  %v3855_v51 = vadd.f32 %v564_v40, %v3253_v11 }
 0x168   : > { %v917_v58 = vsel %vm914_vm6, %v916_v43, %v912_v55  ;;  %v867_v60 = vmul.f32 %v2790_v56, %v866_v33  ;;  %2791 = vrcp.f32 %v3847_v30  ;;  %v1485_v13 = vmul.f32 %v1484_v0, %v3817_v6 }
 0x169   : > { %v918_v36 = vmul.f32 %v917_v58, %v4707_v32  ;;  %vm869_vm9 = vweird.f32 %v3819_v38  ;;  %v875_v41 = vand.u32 2147483648, %v3819_v38  ;;  %v873_v53 = vand.u32 2147483647, %v3819_v38  ;;  %v518_v58 = vpop.f32.mrf.mxu0  ;;  %v567_v42 = vpop.f32.mrf.mxu1 }
 0x16a   : > { %v868_v52 = vadd.f32 %v2790_v56, %v867_v60  ;;  %v982_v10 = vmul.f32 %v981_v34, %v3365_v61  ;;  %v1057_v35 = vadd.f32 0.014752088, %v1056_v59  ;;  %v3864_v21 = vmul.f32 %v1332_v8, %v4708_v47  ;;  %vm3867_vm10 = vmor %vm869_vm9, %vm870_vm8  ;;  %v4713_v60 = vld [vmem:[#allocation18_spill] sm:$0xff] }
 0x16b   : > { %v1408_v28 = vadd.f32 0.05243302, %v1407_v54  ;;  %v2548_v40 = vclamps-f32 %v918_v36, 1.0  ;;  %v1925_v24 = vadd.f32 1.0, %v2546_v46  ;;  %v1448_v43 = vadd.f32 0.05243302, %v1447_v48 }
 0x16c   : > { %4709 = vst [vmem:[#allocation29_spill] sm:$0xff] %v3864_v21  ;;  %v872_v33 = vsel %vm3867_vm10, %v2790_v56, %v868_v52  ;;  %v3874_v38 = vmul.f32 0.70710677, %v3851_v63  ;;  %v3877_v61 = vmul.f32 0.70710677, %v3855_v51  ;;  %v3880_v8 = vmul.f32 0.5, %v3684_v18 }
 0x16d   : > { %v1486_v54 = vadd.f32 0.0036580483, %v1485_v13  ;;  %v1927_v46 = vadd.f32 1.0, %v2548_v40  ;;  %v876_v59 = vor.u32 1.1754944e-38, %v875_v41  ;;  %v1370_v34 = vadd.f32 0.18741608, %v1369_v3 }
 0x16e   : > { %4712 = vst [vmem:[#allocation25_spill] sm:$0xff] %v3880_v8  ;;  %v2792_v55 = vpop.eup %2791  ;;  %vm874_vm11 = vcmp.eq.f32.partialorder %v873_v53, 8.507059e+37  ;;  %v3882_v48 = vadd.f32 1.0, %v982_v10  ;;  %v1058_v56 = vmul.f32 %v1057_v35, %v3420_v17  ;;  %v1957_v32 = vmul.f32 %v1925_v24, %v4713_v60  ;;  %v4714_v36 = vld [vmem:[#allocation21_spill] sm:$0xff]  ;;  %v4715_v24 = vld [vmem:[#allocation27_spill] sm:$0xff]  ;;  %v4716_v60 = vld [vmem:[#allocation16_spill] sm:$0xff] }
 0x16f   : > { %v1959_v52 = vmul.f32 %v1927_v46, %v4714_v36  ;;  %v877_v47 = vsel %vm874_vm11, %v876_v59, %v872_v33  ;;  %v945_v0 = vmul.f32 %v2792_v55, %v3847_v30  ;;  %v1409_v18 = vmul.f32 %v1408_v28, %v3756_v25  ;;  %v4718_v8 = vld [vmem:[#allocation33_spill] sm:$0xff] }
 0x170   : > { %v1449_v13 = vmul.f32 %v1448_v43, %v3770_v16  ;;  %v1521_v3 = vmul.f32 %v3874_v38, %v3874_v38  ;;  %v1561_v41 = vmul.f32 %v3877_v61, %v3877_v61  ;;  %v1487_v53 = vmul.f32 %v1486_v54, %v3817_v6 }
 0x171   : > { %v2003_v10 = vpack.c.bf16 %v1959_v52, %v1957_v32  ;;  %v946_v35 = vsub.f32 1.0, %v945_v0  ;;  %v3896_v40 = vadd.f32 %v518_v58, %v3251_v9  ;;  %v878_v33 = vmul.f32 %v877_v47, %v4715_v24 }
 0x172   : > { %v955_v46 = vand.u32 2147483648, %v3847_v30  ;;  %2793 = vrcp.f32 %v3882_v48  ;;  %v1059_v28 = vadd.f32 0.112945676, %v1058_v56  ;;  %vm950_vm12 = vweird.f32 %v2792_v55 }
 0x173   : > { %2158 = vmatmul.bf16.gmra.mxu2 %v2003_v10  ;;  %v947_v43 = vmul.f32 %v2792_v55, %v946_v35  ;;  %v953_v59 = vand.u32 2147483647, %v3847_v30  ;;  %v1014_v36 = vmul.f32 3.8918573e-05, %v4716_v60  ;;  %v1371_v54 = vmul.f32 %v1370_v34, %v3727_v4 }
 0x174   : > { %v3905_v32 = vmul.f32 0.5, %v3699_v26  ;;  %v3907_v58 = vmin.f32 %v1521_v3, 16.0  ;;  %v3909_v52 = vmin.f32 %v1561_v41, 16.0  ;;  %v1410_v47 = vadd.f32 0.18741608, %v1409_v18 }
 0x175   : > { %v948_v0 = vadd.f32 %v2792_v55, %v947_v43  ;;  %vm949_vm13 = vweird.f32 %v3847_v30  ;;  %v3913_v56 = vmul.f32 0.70710677, %v3896_v40  ;;  %v1450_v10 = vadd.f32 0.18741608, %v1449_v13 }
 0x176   : > { %4717 = vst [vmem:[#allocation32_spill] sm:$0xff] %v3905_v32  ;;  %v2547_v35 = vclamps-f32 %v878_v33, 1.0  ;;  %vm951_vm14 = vmor %vm949_vm13, %vm950_vm12  ;;  %v956_v24 = vor.u32 1.1754944e-38, %v955_v46  ;;  %v1060_v34 = vmul.f32 %v1059_v28, %v3420_v17  ;;  %v1488_v26 = vadd.f32 0.05243302, %v1487_v53 }
 0x177   : > { %v952_v32 = vsel %vm951_vm14, %v2792_v55, %v948_v0  ;;  %vm954_vm15 = vcmp.eq.f32.partialorder %v953_v59, 8.507059e+37  ;;  %v1015_v3 = vadd.f32 0.001143296, %v1014_v36  ;;  %v1523_v18 = vmul.f32 2.1237322e-06, %v3907_v58 }
 0x178   : > { %v2794_v41 = vpop.eup %2793  ;;  %v957_v21 = vsel %vm954_vm15, %v956_v24, %v952_v32  ;;  %v1563_v30 = vmul.f32 2.1237322e-06, %v3909_v52  ;;  %v1061_v43 = vadd.f32 0.4994258, %v1060_v34  ;;  %v1601_v13 = vmul.f32 %v3913_v56, %v3913_v56 }
 0x179   : > { %v958_v39 = vmul.f32 %v957_v21, %v4718_v8  ;;  %v3922_v33 = vadd.f32 %v567_v42, %v3253_v11  ;;  %v985_v53 = vmul.f32 %v2794_v41, %v3882_v48  ;;  %v1372_v55 = vadd.f32 1.1283791, %v1371_v54 }
 0x17a   : > { %v1411_v46 = vmul.f32 %v1410_v47, %v3756_v25  ;;  %v1926_v28 = vadd.f32 1.0, %v2547_v35  ;;  %v1062_v59 = vmul.f32 %v1061_v43, %v3420_v17  ;;  %v1451_v36 = vmul.f32 %v1450_v10, %v3770_v16  ;;  %v4719_v17 = vld [vmem:[#allocation20_spill] sm:$0xff]  ;;  %v4720_v10 = vld [vmem:[#allocation22_spill] sm:$0xff] }
 0x17b   : > { %v2549_v32 = vclamps-f32 %v958_v39, 1.0  ;;  %v986_v0 = vsub.f32 1.0, %v985_v53  ;;  %v1016_v21 = vmul.f32 %v1015_v3, %v4716_v60  ;;  %v1489_v8 = vmul.f32 %v1488_v26, %v3817_v6 }
 0x17c   : > { %v1524_v24 = vadd.f32 0.00028619796, %v1523_v18  ;;  %v1564_v34 = vadd.f32 0.00028619796, %v1563_v30  ;;  %v3930_v42 = vadd.f32 1.0, %v1062_v59  ;;  %v3932_v2 = vmin.f32 %v1601_v13, 16.0 }
 0x17d   : > { %v1928_v1 = vadd.f32 1.0, %v2549_v32  ;;  %v3935_v54 = vmul.f32 0.70710677, %v3922_v33  ;;  %v987_v47 = vmul.f32 %v2794_v41, %v986_v0  ;;  %v1958_v35 = vmul.f32 %v1926_v28, %v4719_v17  ;;  %v4725_v0 = vld [vmem:[#allocation35_spill] sm:$0xff] }
 0x17e   : > { %vm990_vm0 = vweird.f32 %v2794_v41  ;;  %v993_v39 = vand.u32 2147483647, %v3882_v48  ;;  %2795 = vrcp.f32 %v3930_v42  ;;  %v995_v18 = vand.u32 2147483648, %v3882_v48 }
 0x17f   : > { %v1960_v26 = vmul.f32 %v1928_v1, %v4720_v10  ;;  %v988_v3 = vadd.f32 %v2794_v41, %v987_v47  ;;  %v1017_v30 = vadd.f32 0.014752088, %v1016_v21  ;;  %v1412_v43 = vadd.f32 1.1283791, %v1411_v46 }
 0x180   : > { %v3943_v13 = vmul.f32 0.5, %v3715_v29  ;;  %v3946_v53 = vmul.f32 0.5, %v3764_v15  ;;  %vm989_vm1 = vweird.f32 %v3882_v48  ;;  %v3950_v28 = vmul.f32 %v1372_v55, %v3696_v31 }
 0x181   : > { %v2004_v59 = vpack.c.bf16 %v1960_v26, %v1958_v35  ;;  %v1525_v32 = vmul.f32 %v1524_v24, %v3907_v58  ;;  %v1565_v1 = vmul.f32 %v1564_v34, %v3909_v52  ;;  %vm3955_vm2 = vmor %vm989_vm1, %vm990_vm0  ;;  %v1452_v29 = vadd.f32 1.1283791, %v1451_v36 }
 0x182   : > { %4721 = vst [vmem:[#allocation37_spill] sm:$0xff] %v3943_v13  ;;  %v1490_v46 = vadd.f32 0.18741608, %v1489_v8  ;;  %v1641_v15 = vmul.f32 %v3935_v54, %v3935_v54  ;;  %v992_v48 = vsel %vm3955_vm2, %v2794_v41, %v988_v3  ;;  %v1603_v31 = vmul.f32 2.1237322e-06, %v3932_v2 }
 0x183   : > { %4722 = vst [vmem:[#allocation18_spill] sm:$0xff] %v3946_v53  ;;  %2207 = vmatmul.bf16.gmra.mxu3 %v2004_v59  ;;  %vm994_vm3 = vcmp.eq.f32.partialorder %v993_v39, 8.507059e+37  ;;  %v996_v55 = vor.u32 1.1754944e-38, %v995_v18  ;;  %v1018_v21 = vmul.f32 %v1017_v30, %v4716_v60  ;;  %v3966_v34 = vmul.f32 %v1412_v43, %v3721_v7 }
 0x184   : > { %v2796_v24 = vpop.eup %2795  ;;  %v1094_v36 = vmul.f32 3.8918573e-05, %v3439_v12  ;;  %v1134_v8 = vmul.f32 3.8918573e-05, %v3460_v45  ;;  %v1214_v47 = vmul.f32 3.8918573e-05, %v3517_v20  ;;  %v1491_v39 = vmul.f32 %v1490_v46, %v3817_v6 }
 0x185   : > { %v1526_v17 = vadd.f32 0.0036580483, %v1525_v32  ;;  %v1566_v35 = vadd.f32 0.0036580483, %v1565_v1  ;;  %v997_v41 = vsel %vm994_vm3, %v996_v55, %v992_v48  ;;  %v1065_v10 = vmul.f32 %v2796_v24, %v3930_v42 }
 0x186   : > { %v3973_v26 = vmin.f32 %v1641_v15, 16.0  ;;  %v1019_v3 = vadd.f32 0.112945676, %v1018_v21  ;;  %v1095_v18 = vadd.f32 0.001143296, %v1094_v36  ;;  %v1075_v43 = vand.u32 2147483648, %v3930_v42 }
 0x187   : > { %v1604_v30 = vadd.f32 0.00028619796, %v1603_v31  ;;  %v1066_v7 = vsub.f32 1.0, %v1065_v10  ;;  %v1135_v59 = vadd.f32 0.001143296, %v1134_v8  ;;  %v998_v53 = vmul.f32 %v997_v41, %v4725_v0 }
 0x188   : > { %v1020_v13 = vmul.f32 %v1019_v3, %v4716_v60  ;;  %v1096_v32 = vmul.f32 %v1095_v18, %v3439_v12  ;;  %v1215_v1 = vadd.f32 0.001143296, %v1214_v47  ;;  %vm1070_vm4 = vweird.f32 %v2796_v24 }
 0x189   : > { %v1067_v48 = vmul.f32 %v2796_v24, %v1066_v7  ;;  %v1073_v46 = vand.u32 2147483647, %v3930_v42  ;;  %v1136_v15 = vmul.f32 %v1135_v59, %v3460_v45  ;;  %v3982_v55 = vmul.f32 %v1452_v29, %v3731_v22 }
 0x18a   : > { %v1643_v31 = vmul.f32 2.1237322e-06, %v3973_v26  ;;  %v1021_v21 = vadd.f32 0.4994258, %v1020_v13  ;;  %v1097_v36 = vadd.f32 0.014752088, %v1096_v32  ;;  %vm1069_vm5 = vweird.f32 %v3930_v42 }
 0x18b   : > { %v1068_v8 = vadd.f32 %v2796_v24, %v1067_v48  ;;  %v1137_v41 = vadd.f32 0.014752088, %v1136_v15  ;;  %v1216_v10 = vmul.f32 %v1215_v1, %v3517_v20  ;;  %v2550_v47 = vclamps-f32 %v998_v53, 1.0  ;;  %vm1071_vm6 = vmor %vm1069_vm5, %vm1070_vm4 }
 0x18c   : > { %v1076_v3 = vor.u32 1.1754944e-38, %v1075_v43  ;;  %v1022_v18 = vmul.f32 %v1021_v21, %v4716_v60  ;;  %v1098_v7 = vmul.f32 %v1097_v36, %v3439_v12  ;;  %v1492_v59 = vadd.f32 1.1283791, %v1491_v39 }
 0x18d   : > { %v1072_v22 = vsel %vm1071_vm6, %v2796_v24, %v1068_v8  ;;  %vm1074_vm7 = vcmp.eq.f32.partialorder %v1073_v46, 8.507059e+37  ;;  %v1138_v29 = vmul.f32 %v1137_v41, %v3460_v45  ;;  %v1605_v13 = vmul.f32 %v1604_v30, %v3932_v2 }
 0x18e   : > { %v1077_v0 = vsel %vm1074_vm7, %v1076_v3, %v1072_v22  ;;  %v3991_v32 = vadd.f32 1.0, %v1022_v18  ;;  %v1099_v42 = vadd.f32 0.112945676, %v1098_v7  ;;  %v1527_v1 = vmul.f32 %v1526_v17, %v3907_v58  ;;  %v4727_v18 = vld [vmem:[#allocation23_spill] sm:$0xff]  ;;  %v4728_v22 = vld [vmem:[#allocation26_spill] sm:$0xff] }
 0x18f   : > { %v1078_v53 = vmul.f32 %v1077_v0, %v3742_v14  ;;  %v1139_v43 = vadd.f32 0.112945676, %v1138_v29  ;;  %v1217_v48 = vadd.f32 0.014752088, %v1216_v10  ;;  %v1567_v60 = vmul.f32 %v1566_v35, %v3909_v52 }
 0x190   : > { %v1644_v15 = vadd.f32 0.00028619796, %v1643_v31  ;;  %v1929_v39 = vadd.f32 1.0, %v2550_v47  ;;  %2797 = vrcp.f32 %v3991_v32  ;;  %v3998_v24 = vmul.f32 %v1492_v59, %v3783_v19  ;;  %v520_v59 = vpop.f32.mrf.mxu0 }
 0x191   : > { %v2552_v30 = vclamps-f32 %v1078_v53, 1.0  ;;  %v1100_v46 = vmul.f32 %v1099_v42, %v3439_v12  ;;  %v1140_v21 = vmul.f32 %v1139_v43, %v3460_v45  ;;  %v4003_v17 = vmul.f32 0.5, %v3851_v63  ;;  %v569_v63 = vpop.f32.mrf.mxu1 }
 0x192   : > { %v4006_v14 = vmul.f32 0.5, %v3855_v51  ;;  %v1606_v36 = vadd.f32 0.0036580483, %v1605_v13  ;;  %v1174_v35 = vmul.f32 3.8918573e-05, %v3480_v49  ;;  %v1218_v19 = vmul.f32 %v1217_v48, %v3517_v20 }
 0x193   : > { %v1931_v31 = vadd.f32 1.0, %v2552_v30  ;;  %v1101_v8 = vadd.f32 0.4994258, %v1100_v46  ;;  %v1141_v41 = vadd.f32 0.4994258, %v1140_v21  ;;  %v1645_v3 = vmul.f32 %v1644_v15, %v3973_v26 }
 0x194   : > { %4726 = vst [vmem:[#allocation21_spill] sm:$0xff] %v4006_v14  ;;  %v1528_v10 = vadd.f32 0.05243302, %v1527_v1  ;;  %v1568_v47 = vadd.f32 0.05243302, %v1567_v60  ;;  %v1961_v7 = vmul.f32 %v1929_v39, %v4727_v18  ;;  %v4015_v13 = vadd.f32 %v520_v59, %v3251_v9 }
 0x195   : > { %v1963_v29 = vmul.f32 %v1931_v31, %v4728_v22  ;;  %v1102_v51 = vmul.f32 %v1101_v8, %v3439_v12  ;;  %v4018_v0 = vadd.f32 %v569_v63, %v3253_v11  ;;  %v4021_v1 = vmul.f32 0.5, %v3896_v40 }
 0x196   : > { %v2798_v42 = vpop.eup %2797  ;;  %v1607_v53 = vmul.f32 %v1606_v36, %v3932_v2  ;;  %v1142_v43 = vmul.f32 %v1141_v41, %v3460_v45  ;;  %v1175_v48 = vadd.f32 0.001143296, %v1174_v35  ;;  %v1219_v12 = vadd.f32 0.112945676, %v1218_v19 }
 0x197   : > { %4729 = vst [vmem:[#allocation27_spill] sm:$0xff] %v4021_v1  ;;  %v2005_v60 = vpack.c.bf16 %v1963_v29, %v1961_v7  ;;  %v1025_v15 = vmul.f32 %v2798_v42, %v3991_v32  ;;  %v4026_v39 = vadd.f32 1.0, %v1102_v51  ;;  %v1529_v30 = vmul.f32 %v1528_v10, %v3907_v58 }
 0x198   : > { %v1569_v46 = vmul.f32 %v1568_v47, %v3909_v52  ;;  %v1646_v21 = vadd.f32 0.0036580483, %v1645_v3  ;;  %v4031_v31 = vmul.f32 0.70710677, %v4015_v13  ;;  %v4035_v45 = vmul.f32 0.70710677, %v4018_v0 }
 0x199   : > { %2163 = vmatmul.bf16.gmra.mxu2 %v2005_v60  ;;  %v1026_v40 = vsub.f32 1.0, %v1025_v15  ;;  %2799 = vrcp.f32 %v4026_v39  ;;  %v1254_v36 = vmul.f32 3.8918573e-05, %v3559_v44  ;;  %v1608_v35 = vadd.f32 0.05243302, %v1607_v53 }
 0x19a   : > { %4730 = vst [vmem:[#allocation16_spill] sm:$0xff] %v4035_v45  ;;  %v1035_v8 = vand.u32 2147483648, %v3991_v32  ;;  %v4039_v41 = vadd.f32 1.0, %v1142_v43  ;;  %v1176_v19 = vmul.f32 %v1175_v48, %v3480_v49  ;;  %vm1030_vm8 = vweird.f32 %v2798_v42  ;;  %v523_v48 = vpop.f32.mrf.mxu0 }
 0x19b   : > { %v1027_v10 = vmul.f32 %v2798_v42, %v1026_v40  ;;  %v1681_v47 = vmul.f32 %v4031_v31, %v4031_v31  ;;  %v1220_v3 = vmul.f32 %v1219_v12, %v3517_v20  ;;  %v1530_v18 = vadd.f32 0.18741608, %v1529_v30 }
 0x19c   : > { %v1647_v7 = vmul.f32 %v1646_v21, %v3973_v26  ;;  %v1033_v59 = vand.u32 2147483647, %v3991_v32  ;;  %2801 = vrcp.f32 %v4039_v41  ;;  %vm1029_vm9 = vweird.f32 %v3991_v32 }
 0x19d   : > { %v1028_v63 = vadd.f32 %v2798_v42, %v1027_v10  ;;  %v1721_v22 = vmul.f32 %v4035_v45, %v4035_v45  ;;  %v1255_v29 = vadd.f32 0.001143296, %v1254_v36  ;;  %v1570_v51 = vadd.f32 0.18741608, %v1569_v46  ;;  %vm1031_vm10 = vmor %vm1029_vm9, %vm1030_vm8 }
 0x19e   : > { %v1609_v53 = vmul.f32 %v1608_v35, %v3932_v2  ;;  %v4053_v43 = vmul.f32 0.5, %v3922_v33  ;;  %v1177_v60 = vadd.f32 0.014752088, %v1176_v19  ;;  %v1036_v30 = vor.u32 1.1754944e-38, %v1035_v8 }
 0x19f   : > { %v2800_v15 = vpop.eup %2799  ;;  %v1032_v12 = vsel %vm1031_vm10, %v2798_v42, %v1028_v63  ;;  %v4055_v21 = vmin.f32 %v1681_v47, 16.0  ;;  %v1221_v40 = vadd.f32 0.4994258, %v1220_v3  ;;  %v1531_v32 = vmul.f32 %v1530_v18, %v3907_v58 }
 0x1a0   : > { %4731 = vst [vmem:[#allocation33_spill] sm:$0xff] %v4053_v43  ;;  %v1648_v10 = vadd.f32 0.05243302, %v1647_v7  ;;  %vm1034_vm11 = vcmp.eq.f32.partialorder %v1033_v59, 8.507059e+37  ;;  %v1105_v46 = vmul.f32 %v2800_v15, %v4026_v39  ;;  %v4059_v35 = vmin.f32 %v1721_v22, 16.0 }
 0x1a1   : > { %v1037_v36 = vsel %vm1034_vm11, %v1036_v30, %v1032_v12  ;;  %v4062_v33 = vadd.f32 %v523_v48, %v3251_v9  ;;  %v1256_v19 = vmul.f32 %v1255_v29, %v3559_v44  ;;  %v4068_v42 = vmul.f32 %v1570_v51, %v3909_v52  ;;  %v572_v48 = vpop.f32.mrf.mxu1 }
 0x1a2   : > { %v4065_v43 = vpop.eup %2801  ;;  %v1610_v8 = vadd.f32 0.18741608, %v1609_v53  ;;  %v1106_v47 = vsub.f32 1.0, %v1105_v46  ;;  %v1178_v3 = vmul.f32 %v1177_v60, %v3480_v49  ;;  %v1113_v18 = vand.u32 2147483647, %v4026_v39 }
 0x1a3   : > { %4732 = vst [vmem:[#allocation20_spill] sm:$0xff] %v4062_v33  ;;  %v1115_v7 = vand.u32 2147483648, %v4026_v39  ;;  %v1683_v59 = vmul.f32 2.1237322e-06, %v4055_v21  ;;  %v1222_v63 = vmul.f32 %v1221_v40, %v3517_v20  ;;  %v1038_v22 = vmul.f32 %v1037_v36, %v3637_v50 }
 0x1a4   : > { %v1107_v29 = vmul.f32 %v2800_v15, %v1106_v47  ;;  %vm1110_vm12 = vweird.f32 %v2800_v15  ;;  %v1145_v51 = vmul.f32 %v4065_v43, %v4039_v41  ;;  %v1649_v53 = vmul.f32 %v1648_v10, %v3973_v26 }
 0x1a5   : > { %v1723_v60 = vmul.f32 2.1237322e-06, %v4059_v35  ;;  %v4081_v12 = vmul.f32 0.70710677, %v4062_v33  ;;  %v1257_v30 = vadd.f32 0.014752088, %v1256_v19  ;;  %vm1109_vm13 = vweird.f32 %v4026_v39 }
 0x1a6   : > { %v1108_v46 = vadd.f32 %v2800_v15, %v1107_v29  ;;  %v1146_v20 = vsub.f32 1.0, %v1145_v51  ;;  %v1179_v40 = vadd.f32 0.112945676, %v1178_v3  ;;  %vm1111_vm14 = vmor %vm1109_vm13, %vm1110_vm12  ;;  %vm1114_vm15 = vcmp.eq.f32.partialorder %v1113_v18, 8.507059e+37 }
 0x1a7   : > { %v1116_v50 = vor.u32 1.1754944e-38, %v1115_v7  ;;  %v1684_v36 = vadd.f32 0.00028619796, %v1683_v59  ;;  %v4085_v47 = vadd.f32 %v572_v48, %v3253_v11  ;;  %v2551_v1 = vclamps-f32 %v1038_v22, 1.0 }
 0x1a8   : > { %v1112_v10 = vsel %vm1111_vm14, %v2800_v15, %v1108_v46  ;;  %v1147_v14 = vmul.f32 %v4065_v43, %v1146_v20  ;;  %v4088_v45 = vadd.f32 1.0, %v1222_v63  ;;  %v1724_v19 = vadd.f32 0.00028619796, %v1723_v60 }
 0x1a9   : > { %4733 = vst [vmem:[#allocation22_spill] sm:$0xff] %v4085_v47  ;;  %v1117_v33 = vsel %vm1114_vm15, %v1116_v50, %v1112_v10  ;;  %v1761_v39 = vmul.f32 %v4081_v12, %v4081_v12  ;;  %vm1150_vm0 = vweird.f32 %v4065_v43  ;;  %v1155_v7 = vand.u32 2147483648, %v4039_v41 }
 0x1aa   : > { %v1118_v3 = vmul.f32 %v1117_v33, %v3768_v5  ;;  %v1148_v18 = vadd.f32 %v4065_v43, %v1147_v14  ;;  %2803 = vrcp.f32 %v4088_v45  ;;  %v1685_v15 = vmul.f32 %v1684_v36, %v4055_v21 }
 0x1ab   : > { %v4099_v59 = vmul.f32 0.70710677, %v4085_v47  ;;  %vm1149_vm1 = vweird.f32 %v4039_v41  ;;  %v1153_v63 = vand.u32 2147483647, %v4039_v41  ;;  %v1532_v22 = vadd.f32 1.1283791, %v1531_v32 }
 0x1ac   : > { %v2553_v29 = vclamps-f32 %v1118_v3, 1.0  ;;  %v1930_v48 = vadd.f32 1.0, %v2551_v1  ;;  %vm4103_vm2 = vmor %vm1149_vm1, %vm1150_vm0  ;;  %v1180_v14 = vmul.f32 %v1179_v40, %v3480_v49  ;;  %v1611_v33 = vmul.f32 %v1610_v8, %v3932_v2  ;;  %v4736_v40 = vld [vmem:[#allocation24_spill] sm:$0xff] }
 0x1ad   : > { %v1650_v51 = vadd.f32 0.18741608, %v1649_v53  ;;  %v1725_v60 = vmul.f32 %v1724_v19, %v4059_v35  ;;  %v1152_v46 = vsel %vm4103_vm2, %v4065_v43, %v1148_v18  ;;  %v4113_v41 = vmin.f32 %v1761_v39, 16.0  ;;  %v4737_v19 = vld [vmem:[#allocation28_spill] sm:$0xff] }
 0x1ae   : > { %v1932_v20 = vadd.f32 1.0, %v2553_v29  ;;  %v1156_v32 = vor.u32 1.1754944e-38, %v1155_v7  ;;  %v1294_v1 = vmul.f32 3.8918573e-05, %v3586_v62  ;;  %v1686_v50 = vadd.f32 0.0036580483, %v1685_v15 }
 0x1af   : > { %v1801_v36 = vmul.f32 %v4099_v59, %v4099_v59  ;;  %vm1154_vm3 = vcmp.eq.f32.partialorder %v1153_v63, 8.507059e+37  ;;  %v1258_v8 = vmul.f32 %v1257_v30, %v3559_v44  ;;  %v1962_v10 = vmul.f32 %v1930_v48, %v4736_v40 }
 0x1b0   : > { %v2804_v53 = vpop.eup %2803  ;;  %v1964_v3 = vmul.f32 %v1932_v20, %v4737_v19  ;;  %v1157_v5 = vsel %vm1154_vm3, %v1156_v32, %v1152_v46  ;;  %v1181_v43 = vadd.f32 0.4994258, %v1180_v14  ;;  %v4122_v39 = vmul.f32 %v1532_v22, %v3874_v38 }
 0x1b1   : > { %v1572_v18 = vadd.f32 1.1283791, %v4068_v42  ;;  %v1726_v7 = vadd.f32 0.0036580483, %v1725_v60  ;;  %v1225_v15 = vmul.f32 %v2804_v53, %v4088_v45  ;;  %v1612_v29 = vadd.f32 1.1283791, %v1611_v33 }
 0x1b2   : > { %v1651_v63 = vmul.f32 %v1650_v51, %v3973_v26  ;;  %v2006_v47 = vpack.c.bf16 %v1964_v3, %v1962_v10  ;;  %v1763_v30 = vmul.f32 2.1237322e-06, %v4113_v41  ;;  %v1687_v48 = vmul.f32 %v1686_v50, %v4055_v21 }
 0x1b3   : > { %v4129_v40 = vmin.f32 %v1801_v36, 16.0  ;;  %v1158_v14 = vmul.f32 %v1157_v5, %v3773_v37  ;;  %v1226_v46 = vsub.f32 1.0, %v1225_v15  ;;  %v1235_v38 = vand.u32 2147483648, %v4088_v45 }
 0x1b4   : > { %2212 = vmatmul.bf16.gmra.mxu3 %v2006_v47  ;;  %v1182_v42 = vmul.f32 %v1181_v43, %v3480_v49  ;;  %v1259_v22 = vadd.f32 0.112945676, %v1258_v8  ;;  %v1295_v60 = vadd.f32 0.001143296, %v1294_v1  ;;  %v1727_v33 = vmul.f32 %v1726_v7, %v4059_v35 }
 0x1b5   : > { %v1227_v51 = vmul.f32 %v2804_v53, %v1226_v46  ;;  %vm1230_vm4 = vweird.f32 %v2804_v53  ;;  %v1233_v20 = vand.u32 2147483647, %v4088_v45  ;;  %v1374_v47 = vmul.f32 3.8918573e-05, %v3727_v4 }
 0x1b6   : > { %v4136_v32 = vadd.f32 1.0, %v1182_v42  ;;  %v1260_v50 = vmul.f32 %v1259_v22, %v3559_v44  ;;  %v1296_v37 = vmul.f32 %v1295_v60, %v3586_v62  ;;  %v1764_v36 = vadd.f32 0.00028619796, %v1763_v30 }
 0x1b7   : > { %v1803_v10 = vmul.f32 2.1237322e-06, %v4129_v40  ;;  %v1228_v49 = vadd.f32 %v2804_v53, %v1227_v51  ;;  %vm1229_vm5 = vweird.f32 %v4088_v45  ;;  %v1688_v1 = vadd.f32 0.05243302, %v1687_v48 }
 0x1b8   : > { %v2554_v8 = vclamps-f32 %v1158_v14, 1.0  ;;  %vm1231_vm6 = vmor %vm1229_vm5, %vm1230_vm4  ;;  %v1236_v19 = vor.u32 1.1754944e-38, %v1235_v38  ;;  %2805 = vrcp.f32 %v4136_v32  ;;  %v1652_v3 = vadd.f32 1.1283791, %v1651_v63 }
 0x1b9   : > { %v1232_v5 = vsel %vm1231_vm6, %v2804_v53, %v1228_v49  ;;  %vm1234_vm7 = vcmp.eq.f32.partialorder %v1233_v20, 8.507059e+37  ;;  %v1261_v43 = vadd.f32 0.4994258, %v1260_v50  ;;  %v4145_v7 = vmul.f32 %v1572_v18, %v3877_v61 }
 0x1ba   : > { %v1237_v15 = vsel %vm1234_vm7, %v1236_v19, %v1232_v5  ;;  %v1297_v30 = vadd.f32 0.014752088, %v1296_v37  ;;  %v1375_v46 = vadd.f32 0.001143296, %v1374_v47  ;;  %v1728_v42 = vadd.f32 0.05243302, %v1727_v33 }
 0x1bb   : > { %v1765_v22 = vmul.f32 %v1764_v36, %v4113_v41  ;;  %v1238_v45 = vmul.f32 %v1237_v15, %v3786_v23  ;;  %v1262_v48 = vmul.f32 %v1261_v43, %v3559_v44  ;;  %v1689_v14 = vmul.f32 %v1688_v1, %v4055_v21  ;;  %v4739_v1 = vld [vmem:[#allocation34_spill] sm:$0xff]  ;;  %v574_v15 = vpop.f32.mrf.mxu1 }
 0x1bc   : > { %v1804_v38 = vadd.f32 0.00028619796, %v1803_v10  ;;  %v1933_v63 = vadd.f32 1.0, %v2554_v8  ;;  %v1298_v53 = vmul.f32 %v1297_v30, %v3586_v62  ;;  %v4153_v60 = vmul.f32 %v1612_v29, %v3913_v56 }
 0x1bd   : > { %v4156_v61 = vmul.f32 %v1652_v3, %v3935_v54  ;;  %v2556_v18 = vclamps-f32 %v1238_v45, 1.0  ;;  %v4158_v33 = vadd.f32 1.0, %v1262_v48  ;;  %v4161_v23 = vmul.f32 0.5, %v4015_v13  ;;  %v525_v54 = vpop.f32.mrf.mxu0  ;;  %v4738_v13 = vld [vmem:[#allocation30_spill] sm:$0xff] }
 0x1be   : > { %v2806_v51 = vpop.eup %2805  ;;  %v4164_v44 = vmul.f32 0.5, %v4018_v0  ;;  %v1299_v20 = vadd.f32 0.112945676, %v1298_v53  ;;  %v1376_v50 = vmul.f32 %v1375_v46, %v3727_v4  ;;  %v1729_v37 = vmul.f32 %v1728_v42, %v4059_v35 }
 0x1bf   : > { %v1935_v56 = vadd.f32 1.0, %v2556_v18  ;;  %v1185_v29 = vmul.f32 %v2806_v51, %v4136_v32  ;;  %2807 = vrcp.f32 %v4158_v33  ;;  %v1690_v47 = vadd.f32 0.18741608, %v1689_v14 }
 0x1c0   : > { %v1766_v36 = vadd.f32 0.0036580483, %v1765_v22  ;;  %v1805_v10 = vmul.f32 %v1804_v38, %v4129_v40  ;;  %v1965_v49 = vmul.f32 %v1933_v63, %v4738_v13  ;;  %v1193_v19 = vand.u32 2147483647, %v4136_v32 }
 0x1c1   : > { %v1967_v0 = vmul.f32 %v1935_v56, %v4739_v1  ;;  %v1186_v8 = vsub.f32 1.0, %v1185_v29  ;;  %v1300_v3 = vmul.f32 %v1299_v20, %v3586_v62  ;;  %v1195_v5 = vand.u32 2147483648, %v4136_v32 }
 0x1c2   : > { %v4177_v43 = vadd.f32 %v525_v54, %v3251_v9  ;;  %v1377_v30 = vadd.f32 0.014752088, %v1376_v50  ;;  %v1334_v46 = vmul.f32 3.8918573e-05, %v3621_v27  ;;  %vm1190_vm8 = vweird.f32 %v2806_v51 }
 0x1c3   : > { %v2007_v42 = vpack.c.bf16 %v1967_v0, %v1965_v49  ;;  %v1187_v22 = vmul.f32 %v2806_v51, %v1186_v8  ;;  %v1301_v45 = vadd.f32 0.4994258, %v1300_v3  ;;  %v1730_v48 = vadd.f32 0.18741608, %v1729_v37 }
 0x1c4   : > { %v1767_v14 = vmul.f32 %v1766_v36, %v4113_v41  ;;  %v1806_v38 = vadd.f32 0.0036580483, %v1805_v10  ;;  %v1378_v63 = vmul.f32 %v1377_v30, %v3727_v4  ;;  %vm1189_vm9 = vweird.f32 %v4136_v32 }
 0x1c5   : > { %v2808_v53 = vpop.eup %2807  ;;  %2168 = vmatmul.bf16.gmra.mxu2 %v2007_v42  ;;  %v1188_v18 = vadd.f32 %v2806_v51, %v1187_v22  ;;  %v4184_v9 = vadd.f32 %v574_v15, %v3253_v11  ;;  %v1302_v20 = vmul.f32 %v1301_v45, %v3586_v62  ;;  %vm1191_vm10 = vmor %vm1189_vm9, %vm1190_vm8  ;;  %v1196_v50 = vor.u32 1.1754944e-38, %v1195_v5 }
 0x1c6   : > { %v1265_v56 = vmul.f32 %v2808_v53, %v4158_v33  ;;  %v4189_v37 = vmul.f32 0.70710677, %v4177_v43  ;;  %v1379_v29 = vadd.f32 0.112945676, %v1378_v63  ;;  %vm1194_vm11 = vcmp.eq.f32.partialorder %v1193_v19, 8.507059e+37 }
 0x1c7   : > { %v1192_v54 = vsel %vm1191_vm10, %v2806_v51, %v1188_v18  ;;  %v4191_v36 = vadd.f32 1.0, %v1302_v20  ;;  %v1335_v10 = vadd.f32 0.001143296, %v1334_v46  ;;  %v1691_v32 = vmul.f32 %v1690_v47, %v4055_v21 }
 0x1c8   : > { %v1197_v13 = vsel %vm1194_vm11, %v1196_v50, %v1192_v54  ;;  %v1266_v11 = vsub.f32 1.0, %v1265_v56  ;;  %v1380_v49 = vmul.f32 %v1379_v29, %v3727_v4  ;;  %v1273_v62 = vand.u32 2147483647, %v4158_v33 }
 0x1c9   : > { %v1275_v1 = vand.u32 2147483648, %v4158_v33  ;;  %v4198_v0 = vmul.f32 0.70710677, %v4184_v9  ;;  %2809 = vrcp.f32 %v4191_v36  ;;  %v1198_v51 = vmul.f32 %v1197_v13, %v3777_v57 }
 0x1ca   : > { %v1267_v8 = vmul.f32 %v2808_v53, %v1266_v11  ;;  %vm1270_vm12 = vweird.f32 %v2808_v53  ;;  %v1841_v47 = vmul.f32 %v4189_v37, %v4189_v37  ;;  %v1731_v19 = vmul.f32 %v1730_v48, %v4059_v35 }
 0x1cb   : > { %v1381_v3 = vadd.f32 0.4994258, %v1380_v49  ;;  %v1336_v5 = vmul.f32 %v1335_v10, %v3621_v27  ;;  %v1414_v15 = vmul.f32 3.8918573e-05, %v3756_v25  ;;  %v1768_v30 = vadd.f32 0.05243302, %v1767_v14 }
 0x1cc   : > { %v1807_v46 = vmul.f32 %v1806_v38, %v4129_v40  ;;  %v1268_v42 = vadd.f32 %v2808_v53, %v1267_v8  ;;  %vm1269_vm13 = vweird.f32 %v4158_v33  ;;  %v1276_v57 = vor.u32 1.1754944e-38, %v1275_v1  ;;  %v4740_v10 = vld [vmem:[#allocation17_spill] sm:$0xff] }
 0x1cd   : > { %vm1271_vm14 = vmor %vm1269_vm13, %vm1270_vm12  ;;  %v1881_v22 = vmul.f32 %v4198_v0, %v4198_v0  ;;  %v1382_v45 = vmul.f32 %v1381_v3, %v3727_v4  ;;  %v1454_v48 = vmul.f32 3.8918573e-05, %v3770_v16  ;;  %v2555_v63 = vclamps-f32 %v1198_v51, 1.0 }
 0x1ce   : > { %v1272_v18 = vsel %vm1271_vm14, %v2808_v53, %v1268_v42  ;;  %vm1274_vm15 = vcmp.eq.f32.partialorder %v1273_v62, 8.507059e+37  ;;  %v4213_v20 = vmin.f32 %v1841_v47, 16.0  ;;  %v1337_v56 = vadd.f32 0.014752088, %v1336_v5 }
 0x1cf   : > { %v2810_v14 = vpop.eup %2809  ;;  %v1277_v50 = vsel %vm1274_vm15, %v1276_v57, %v1272_v18  ;;  %v4215_v38 = vadd.f32 1.0, %v1382_v45  ;;  %v1415_v33 = vadd.f32 0.001143296, %v1414_v15  ;;  %v4217_v29 = vadd.f32 1.1283791, %v1691_v32  ;;  %v4741_v45 = vld [vmem:[#allocation31_spill] sm:$0xff] }
 0x1d0   : > { %v4219_v54 = vadd.f32 1.1283791, %v1731_v19  ;;  %v1278_v13 = vmul.f32 %v1277_v50, %v4740_v10  ;;  %v1305_v4 = vmul.f32 %v2810_v14, %v4191_v36  ;;  %v4224_v11 = vmul.f32 %v1768_v30, %v4113_v41 }
 0x1d1   : > { %v4226_v53 = vadd.f32 0.05243302, %v1807_v46  ;;  %2811 = vrcp.f32 %v4215_v38  ;;  %v1455_v49 = vadd.f32 0.001143296, %v1454_v48  ;;  %v1934_v1 = vadd.f32 1.0, %v2555_v63  ;;  %v4742_v63 = vld [vmem:[#allocation36_spill] sm:$0xff] }
 0x1d2   : > { %v2557_v62 = vclamps-f32 %v1278_v13, 1.0  ;;  %v1306_v51 = vsub.f32 1.0, %v1305_v4  ;;  %v1315_v32 = vand.u32 2147483648, %v4191_v36  ;;  %v4231_v8 = vmul.f32 2.1237322e-06, %v4213_v20 }
 0x1d3   : > { %v4233_v47 = vmin.f32 %v1881_v22, 16.0  ;;  %v1338_v19 = vmul.f32 %v1337_v56, %v3621_v27  ;;  %v1416_v3 = vmul.f32 %v1415_v33, %v3756_v25  ;;  %vm1310_vm0 = vweird.f32 %v2810_v14 }
 0x1d4   : > { %v1936_v5 = vadd.f32 1.0, %v2557_v62  ;;  %v1307_v15 = vmul.f32 %v2810_v14, %v1306_v51  ;;  %v1313_v30 = vand.u32 2147483647, %v4191_v36  ;;  %vm1309_vm1 = vweird.f32 %v4191_v36 }
 0x1d5   : > { %v1339_v46 = vadd.f32 0.112945676, %v1338_v19  ;;  %v1417_v42 = vadd.f32 0.014752088, %v1416_v3  ;;  %v1456_v57 = vmul.f32 %v1455_v49, %v3770_v16  ;;  %v1966_v48 = vmul.f32 %v1934_v1, %v4741_v45  ;;  %vm1311_vm2 = vmor %vm1309_vm1, %vm1310_vm0  ;;  %v4743_v3 = vld [vmem:[#allocation19_spill] sm:$0xff] }
 0x1d6   : > { %v1968_v22 = vmul.f32 %v1936_v5, %v4742_v63  ;;  %v1308_v18 = vadd.f32 %v2810_v14, %v1307_v15  ;;  %v1316_v50 = vor.u32 1.1754944e-38, %v1315_v32  ;;  %v1534_v4 = vmul.f32 3.8918573e-05, %v3907_v58 }
 0x1d7   : > { %v2812_v56 = vpop.eup %2811  ;;  %v1340_v33 = vmul.f32 %v1339_v46, %v3621_v27  ;;  %v1418_v10 = vmul.f32 %v1417_v42, %v3756_v25  ;;  %v1457_v13 = vadd.f32 0.014752088, %v1456_v57  ;;  %vm1314_vm3 = vcmp.eq.f32.partialorder %v1313_v30, 8.507059e+37 }
 0x1d8   : > { %v2008_v36 = vpack.c.bf16 %v1968_v22, %v1966_v48  ;;  %v1312_v62 = vsel %vm1311_vm2, %v2810_v14, %v1308_v18  ;;  %v1385_v49 = vmul.f32 %v2812_v56, %v4215_v38  ;;  %v1393_v1 = vand.u32 2147483647, %v4215_v38 }
 0x1d9   : > { %v1317_v51 = vsel %vm1314_vm3, %v1316_v50, %v1312_v62  ;;  %v1395_v19 = vand.u32 2147483648, %v4215_v38  ;;  %v1341_v32 = vadd.f32 0.4994258, %v1340_v33  ;;  %v1419_v46 = vadd.f32 0.112945676, %v1418_v10 }
 0x1da   : > { %2217 = vmatmul.bf16.gmra.mxu3 %v2008_v36  ;;  %v1318_v5 = vmul.f32 %v1317_v51, %v4743_v3  ;;  %v1386_v15 = vsub.f32 1.0, %v1385_v49  ;;  %v1458_v42 = vmul.f32 %v1457_v13, %v3770_v16  ;;  %vm1390_vm4 = vweird.f32 %v2812_v56 }
 0x1db   : > { %v1342_v57 = vmul.f32 %v1341_v32, %v3621_v27  ;;  %v1535_v14 = vadd.f32 0.001143296, %v1534_v4  ;;  %v1494_v30 = vmul.f32 3.8918573e-05, %v3817_v6  ;;  %v1420_v48 = vmul.f32 %v1419_v46, %v3756_v25 }
 0x1dc   : > { %v1387_v45 = vmul.f32 %v2812_v56, %v1386_v15  ;;  %v1459_v63 = vadd.f32 0.112945676, %v1458_v42  ;;  %v1574_v22 = vmul.f32 3.8918573e-05, %v3909_v52  ;;  %v2558_v18 = vclamps-f32 %v1318_v5, 1.0 }
 0x1dd   : > { %vm1389_vm5 = vweird.f32 %v4215_v38  ;;  %v4255_v50 = vadd.f32 1.0, %v1342_v57  ;;  %v1536_v33 = vmul.f32 %v1535_v14, %v3907_v58  ;;  %v1421_v13 = vadd.f32 0.4994258, %v1420_v48 }
 0x1de   : > { %v1388_v10 = vadd.f32 %v2812_v56, %v1387_v45  ;;  %v1460_v27 = vmul.f32 %v1459_v63, %v3770_v16  ;;  %v1495_v4 = vadd.f32 0.001143296, %v1494_v30  ;;  %v1883_v36 = vmul.f32 2.1237322e-06, %v4233_v47  ;;  %vm1391_vm6 = vmor %vm1389_vm5, %vm1390_vm4 }
 0x1df   : > { %vm1394_vm7 = vcmp.eq.f32.partialorder %v1393_v1, 8.507059e+37  ;;  %v1396_v62 = vor.u32 1.1754944e-38, %v1395_v19  ;;  %2813 = vrcp.f32 %v4255_v50  ;;  %v1422_v38 = vmul.f32 %v1421_v13, %v3756_v25 }
 0x1e0   : > { %v1392_v49 = vsel %vm1391_vm6, %v2812_v56, %v1388_v10  ;;  %v1461_v51 = vadd.f32 0.4994258, %v1460_v27  ;;  %v1575_v32 = vadd.f32 0.001143296, %v1574_v22  ;;  %v1937_v5 = vadd.f32 1.0, %v2558_v18  ;;  %v4744_v22 = vld [vmem:[#allocation38_spill] sm:$0xff] }
 0x1e1   : > { %v1397_v3 = vsel %vm1394_vm7, %v1396_v62, %v1392_v49  ;;  %v1353_v15 = vand.u32 2147483647, %v4255_v50  ;;  %v1537_v46 = vadd.f32 0.014752088, %v1536_v33  ;;  %v4265_v57 = vadd.f32 1.0, %v1422_v38 }
 0x1e2   : > { %v1398_v42 = vmul.f32 %v1397_v3, %v3950_v28  ;;  %v1462_v14 = vmul.f32 %v1461_v51, %v3770_v16  ;;  %v1496_v1 = vmul.f32 %v1495_v4, %v3817_v6  ;;  %v4271_v56 = vmul.f32 %v4217_v29, %v4031_v31 }
 0x1e3   : > { %v4274_v25 = vadd.f32 0.00028619796, %v4231_v8  ;;  %v1355_v19 = vand.u32 2147483648, %v4255_v50  ;;  %v1538_v30 = vmul.f32 %v1537_v46, %v3907_v58  ;;  %v4278_v45 = vadd.f32 0.00028619796, %v1883_v36  ;;  %v4747_v36 = vld [vmem:[#allocation25_spill] sm:$0xff] }
 0x1e4   : > { %v2560_v28 = vclamps-f32 %v1398_v42, 1.0  ;;  %vm1349_vm8 = vweird.f32 %v4255_v50  ;;  %2815 = vrcp.f32 %v4265_v57  ;;  %v4282_v48 = vadd.f32 1.0, %v1462_v14 }
 0x1e5   : > { %v2814_v16 = vpop.eup %2813  ;;  %v1539_v63 = vadd.f32 0.112945676, %v1538_v30  ;;  %v1497_v31 = vadd.f32 0.014752088, %v1496_v1  ;;  %v1576_v29 = vmul.f32 %v1575_v32, %v3909_v52  ;;  %v1969_v18 = vmul.f32 %v1937_v5, %v4744_v22 }
 0x1e6   : > { %v1939_v8 = vadd.f32 1.0, %v2560_v28  ;;  %v1345_v33 = vmul.f32 %v2814_v16, %v4255_v50  ;;  %vm4287_vm9 = vcmp.eq.f32.partialorder %v1353_v15, 8.507059e+37  ;;  %v1356_v13 = vor.u32 1.1754944e-38, %v1355_v19  ;;  %v4750_v50 = vld [vmem:[#allocation29_spill] sm:$0xff] }
 0x1e7   : > { %v1433_v27 = vand.u32 2147483647, %v4265_v57  ;;  %v1435_v4 = vand.u32 2147483648, %v4265_v57  ;;  %2817 = vrcp.f32 %v4282_v48  ;;  %v1540_v38 = vmul.f32 %v1539_v63, %v3907_v58 }
 0x1e8   : > { %v1971_v62 = vmul.f32 %v1939_v8, %v4747_v36  ;;  %v1346_v49 = vsub.f32 1.0, %v1345_v33  ;;  %v1614_v51 = vmul.f32 3.8918573e-05, %v3932_v2  ;;  %vm1429_vm10 = vweird.f32 %v4265_v57 }
 0x1e9   : > { %v1498_v32 = vmul.f32 %v1497_v31, %v3817_v6  ;;  %v1577_v3 = vadd.f32 0.014752088, %v1576_v29  ;;  %v1694_v5 = vmul.f32 3.8918573e-05, %v4055_v21  ;;  %vm1350_vm11 = vweird.f32 %v2814_v16 }
 0x1ea   : > { %v2816_v15 = vpop.eup %2815  ;;  %v2009_v46 = vpack.c.bf16 %v1971_v62, %v1969_v18  ;;  %v1347_v42 = vmul.f32 %v2814_v16, %v1346_v49  ;;  %v1541_v14 = vadd.f32 0.4994258, %v1540_v38  ;;  %vm4301_vm12 = vcmp.eq.f32.partialorder %v1433_v27, 8.507059e+37  ;;  %vm1351_vm14 = vmor %vm1349_vm8, %vm1350_vm11 }
 0x1eb   : > { %v1425_v1 = vmul.f32 %v2816_v15, %v4265_v57  ;;  %v1436_v30 = vor.u32 1.1754944e-38, %v1435_v4  ;;  %v1499_v28 = vadd.f32 0.112945676, %v1498_v32  ;;  %v1578_v63 = vmul.f32 %v1577_v3, %v3909_v52 }
 0x1ec   : > { %2173 = vmatmul.bf16.gmra.mxu2 %v2009_v46  ;;  %v1348_v31 = vadd.f32 %v2814_v16, %v1347_v42  ;;  %vm1469_vm13 = vweird.f32 %v4282_v48  ;;  %v1473_v29 = vand.u32 2147483647, %v4282_v48  ;;  %v1475_v8 = vand.u32 2147483648, %v4282_v48 }
 0x1ed   : > { %v1542_v22 = vmul.f32 %v1541_v14, %v3907_v58  ;;  %v2818_v18 = vpop.eup %2817  ;;  %v1426_v33 = vsub.f32 1.0, %v1425_v1  ;;  %v1500_v27 = vmul.f32 %v1499_v28, %v3817_v6  ;;  %v1579_v4 = vadd.f32 0.112945676, %v1578_v63 }
 0x1ee   : > { %v1615_v36 = vadd.f32 0.001143296, %v1614_v51  ;;  %v1352_v62 = vsel %vm1351_vm14, %v2814_v16, %v1348_v31  ;;  %vm1430_vm15 = vweird.f32 %v2816_v15  ;;  %v1465_v49 = vmul.f32 %v2818_v18, %v4282_v48 }
 0x1ef   : > { %v4314_v38 = vadd.f32 1.0, %v1542_v22  ;;  %v1357_v32 = vsel %vm4287_vm9, %v1356_v13, %v1352_v62  ;;  %v1427_v3 = vmul.f32 %v2816_v15, %v1426_v33  ;;  %v1501_v58 = vadd.f32 0.4994258, %v1500_v27  ;;  %vm1431_vm1 = vmor %vm1429_vm10, %vm1430_vm15 }
 0x1f0   : > { %v1580_v46 = vmul.f32 %v1579_v4, %v3909_v52  ;;  %v1358_v42 = vmul.f32 %v1357_v32, %v4750_v50  ;;  %v1466_v14 = vsub.f32 1.0, %v1465_v49  ;;  %vm4320_vm0 = vcmp.eq.f32.partialorder %v1473_v29, 8.507059e+37 }
 0x1f1   : > { %2819 = vrcp.f32 %v4314_v38  ;;  %v1428_v16 = vadd.f32 %v2816_v15, %v1427_v3  ;;  %v1476_v51 = vor.u32 1.1754944e-38, %v1475_v8  ;;  %v1502_v28 = vmul.f32 %v1501_v58, %v3817_v6 }
 0x1f2   : > { %v1616_v10 = vmul.f32 %v1615_v36, %v3932_v2  ;;  %v2559_v13 = vclamps-f32 %v1358_v42, 1.0  ;;  %v1467_v63 = vmul.f32 %v2818_v18, %v1466_v14  ;;  %vm1470_vm2 = vweird.f32 %v2818_v18  ;;  %v4755_v42 = vld [vmem:[#allocation39_spill] sm:$0xff] }
 0x1f3   : > { %v1581_v31 = vadd.f32 0.4994258, %v1580_v46  ;;  %v1432_v29 = vsel %vm1431_vm1, %v2816_v15, %v1428_v16  ;;  %v1553_v22 = vand.u32 2147483647, %v4314_v38  ;;  %v1555_v33 = vand.u32 2147483648, %v4314_v38  ;;  %vm1471_vm3 = vmor %vm1469_vm13, %vm1470_vm2 }
 0x1f4   : > { %v4332_v27 = vadd.f32 1.0, %v1502_v28  ;;  %v1437_v6 = vsel %vm4301_vm12, %v1436_v30, %v1432_v29  ;;  %v1468_v8 = vadd.f32 %v2818_v18, %v1467_v63  ;;  %v1695_v36 = vadd.f32 0.001143296, %v1694_v5 }
 0x1f5   : > { %v1582_v4 = vmul.f32 %v1581_v31, %v3909_v52  ;;  %v1438_v57 = vmul.f32 %v1437_v6, %v3966_v34  ;;  %v1938_v62 = vadd.f32 1.0, %v2559_v13  ;;  %v1654_v15 = vmul.f32 3.8918573e-05, %v3973_v26  ;;  %v4756_v13 = vld [vmem:[#allocation32_spill] sm:$0xff] }
 0x1f6   : > { %2821 = vrcp.f32 %v4332_v27  ;;  %v1472_v32 = vsel %vm1471_vm3, %v2818_v18, %v1468_v8  ;;  %vm1549_vm4 = vweird.f32 %v4314_v38  ;;  %v1617_v30 = vadd.f32 0.014752088, %v1616_v10 }
 0x1f7   : > { %v2820_v49 = vpop.eup %2819  ;;  %v4343_v19 = vadd.f32 1.0, %v1582_v4  ;;  %v2561_v3 = vclamps-f32 %v1438_v57, 1.0  ;;  %v1477_v52 = vsel %vm4320_vm0, %v1476_v51, %v1472_v32  ;;  %vm4348_vm5 = vcmp.eq.f32.partialorder %v1553_v22, 8.507059e+37 }
 0x1f8   : > { %v1545_v34 = vmul.f32 %v2820_v49, %v4314_v38  ;;  %v1556_v5 = vor.u32 1.1754944e-38, %v1555_v33  ;;  %v1478_v58 = vmul.f32 %v1477_v52, %v3982_v55  ;;  %v1513_v18 = vand.u32 2147483647, %v4332_v27 }
 0x1f9   : > { %v1515_v46 = vand.u32 2147483648, %v4332_v27  ;;  %2823 = vrcp.f32 %v4343_v19  ;;  %v1940_v50 = vadd.f32 1.0, %v2561_v3  ;;  %v1970_v14 = vmul.f32 %v1938_v62, %v4755_v42 }
 0x1fa   : > { %v1546_v1 = vsub.f32 1.0, %v1545_v34  ;;  %vm1550_vm6 = vweird.f32 %v2820_v49  ;;  %v2562_v16 = vclamps-f32 %v1478_v58, 1.0  ;;  %vm1509_vm7 = vweird.f32 %v4332_v27 }
 0x1fb   : > { %v1595_v51 = vand.u32 2147483648, %v4343_v19  ;;  %v1618_v28 = vmul.f32 %v1617_v30, %v3932_v2  ;;  %v1696_v55 = vmul.f32 %v1695_v36, %v4055_v21  ;;  %v1972_v63 = vmul.f32 %v1940_v50, %v4756_v13  ;;  %vm1551_vm11 = vmor %vm1549_vm4, %vm1550_vm6 }
 0x1fc   : > { %v2822_v10 = vpop.eup %2821  ;;  %v1547_v31 = vmul.f32 %v2820_v49, %v1546_v1  ;;  %v1593_v29 = vand.u32 2147483647, %v4343_v19  ;;  %v1655_v22 = vadd.f32 0.001143296, %v1654_v15  ;;  %v1941_v33 = vadd.f32 1.0, %v2562_v16 }
 0x1fd   : > { %v1505_v6 = vmul.f32 %v2822_v10, %v4332_v27  ;;  %vm1510_vm8 = vweird.f32 %v2822_v10  ;;  %vm4364_vm9 = vcmp.eq.f32.partialorder %v1513_v18, 8.507059e+37  ;;  %v1516_v4 = vor.u32 1.1754944e-38, %v1515_v46 }
 0x1fe   : > { %v2010_v57 = vpack.c.bf16 %v1972_v63, %v1970_v14  ;;  %v1548_v62 = vadd.f32 %v2820_v49, %v1547_v31  ;;  %vm1589_vm10 = vweird.f32 %v4343_v19  ;;  %v1619_v36 = vadd.f32 0.112945676, %v1618_v28  ;;  %vm1511_vm14 = vmor %vm1509_vm7, %vm1510_vm8 }
 0x1ff   : > { %v1697_v32 = vadd.f32 0.014752088, %v1696_v55  ;;  %v2824_v30 = vpop.eup %2823  ;;  %v1506_v15 = vsub.f32 1.0, %v1505_v6  ;;  %v1596_v3 = vor.u32 1.1754944e-38, %v1595_v51  ;;  %v1656_v52 = vmul.f32 %v1655_v22, %v3973_v26 }
 0x200   : > { %v1734_v34 = vmul.f32 3.8918573e-05, %v4059_v35  ;;  %2222 = vmatmul.bf16.gmra.mxu3 %v2010_v57  ;;  %v1552_v58 = vsel %vm1551_vm11, %v2820_v49, %v1548_v62  ;;  %v1585_v18 = vmul.f32 %v2824_v30, %v4343_v19  ;;  %vm1590_vm12 = vweird.f32 %v2824_v30 }
 0x201   : > { %vm4375_vm13 = vcmp.eq.f32.partialorder %v1593_v29, 8.507059e+37  ;;  %v1620_v50 = vmul.f32 %v1619_v36, %v3932_v2  ;;  %v1557_v38 = vsel %vm4348_vm5, %v1556_v5, %v1552_v58  ;;  %v1507_v42 = vmul.f32 %v2822_v10, %v1506_v15  ;;  %vm1591_vm15 = vmor %vm1589_vm10, %vm1590_vm12 }
 0x202   : > { %v1698_v14 = vmul.f32 %v1697_v32, %v4055_v21  ;;  %v1657_v1 = vadd.f32 0.014752088, %v1656_v52  ;;  %v1558_v16 = vmul.f32 %v1557_v38, %v4122_v39  ;;  %v1586_v51 = vsub.f32 1.0, %v1585_v18  ;;  %v4761_v39 = vld [vmem:[#allocation37_spill] sm:$0xff] }
 0x203   : > { %v1621_v49 = vadd.f32 0.4994258, %v1620_v50  ;;  %v1735_v28 = vadd.f32 0.001143296, %v1734_v34  ;;  %v1508_v55 = vadd.f32 %v2822_v10, %v1507_v42  ;;  %v1774_v31 = vmul.f32 3.8918573e-05, %v4113_v41 }
 0x204   : > { %v1699_v13 = vadd.f32 0.112945676, %v1698_v14  ;;  %v1658_v63 = vmul.f32 %v1657_v1, %v3973_v26  ;;  %v2564_v29 = vclamps-f32 %v1558_v16, 1.0  ;;  %v1587_v48 = vmul.f32 %v2824_v30, %v1586_v51 }
 0x205   : > { %v1622_v5 = vmul.f32 %v1621_v49, %v3932_v2  ;;  %v1736_v22 = vmul.f32 %v1735_v28, %v4059_v35  ;;  %v1973_v6 = vmul.f32 %v1941_v33, %v4761_v39  ;;  %v1512_v57 = vsel %vm1511_vm14, %v2822_v10, %v1508_v55 }
 0x206   : > { %v1700_v62 = vmul.f32 %v1699_v13, %v4055_v21  ;;  %v1659_v36 = vadd.f32 0.112945676, %v1658_v63  ;;  %v1943_v32 = vadd.f32 1.0, %v2564_v29  ;;  %v1517_v15 = vsel %vm4364_vm9, %v1516_v4, %v1512_v57 }
 0x207   : > { %v1588_v52 = vadd.f32 %v2824_v30, %v1587_v48  ;;  %v4395_v34 = vadd.f32 1.0, %v1622_v5  ;;  %v1518_v27 = vmul.f32 %v1517_v15, %v3998_v24  ;;  %v1737_v10 = vadd.f32 0.014752088, %v1736_v22  ;;  %v4763_v48 = vld [vmem:[#allocation18_spill] sm:$0xff]  ;;  %v4764_v22 = vld [vmem:[#allocation21_spill] sm:$0xff] }
 0x208   : > { %v1701_v2 = vadd.f32 0.4994258, %v1700_v62  ;;  %v1660_v33 = vmul.f32 %v1659_v36, %v3973_v26  ;;  %v1975_v58 = vmul.f32 %v1943_v32, %v4003_v17  ;;  %v1775_v8 = vadd.f32 0.001143296, %v1774_v31 }
 0x209   : > { %v1592_v18 = vsel %vm1591_vm15, %v2824_v30, %v1588_v52  ;;  %2825 = vrcp.f32 %v4395_v34  ;;  %v1845_v4 = vmul.f32 %v4274_v25, %v4213_v20  ;;  %v1885_v24 = vmul.f32 %v4278_v45, %v4233_v47  ;;  %v4762_v30 = vld [vmem:[#allocation16_spill] sm:$0xff] }
 0x20a   : > { %v2563_v50 = vclamps-f32 %v1518_v27, 1.0  ;;  %v1597_v19 = vsel %vm4375_vm13, %v1596_v3, %v1592_v18  ;;  %v2011_v38 = vpack.c.bf16 %v1975_v58, %v1973_v6  ;;  %v1702_v14 = vmul.f32 %v1701_v2, %v4055_v21 }
 0x20b   : > { %v1598_v42 = vmul.f32 %v1597_v19, %v4145_v7  ;;  %v1661_v17 = vadd.f32 0.4994258, %v1660_v33  ;;  %v4414_v1 = vmul.f32 %v4219_v54, %v4762_v30  ;;  %v4417_v16 = vadd.f32 0.18741608, %v4224_v11 }
 0x20c   : > { %v1942_v25 = vadd.f32 1.0, %v2563_v50  ;;  %v1738_v45 = vmul.f32 %v1737_v10, %v4059_v35  ;;  %2178 = vmatmul.bf16.gmra.mxu2 %v2011_v38  ;;  %v4420_v46 = vadd.f32 1.0, %v1702_v14  ;;  %v1776_v7 = vmul.f32 %v1775_v8, %v4113_v41 }
 0x20d   : > { %v2565_v51 = vclamps-f32 %v1598_v42, 1.0  ;;  %v1662_v3 = vmul.f32 %v1661_v17, %v3973_v26  ;;  %v4426_v21 = vmul.f32 %v4226_v53, %v4129_v40  ;;  %v1846_v54 = vadd.f32 0.0036580483, %v1845_v4 }
 0x20e   : > { %v1886_v49 = vadd.f32 0.0036580483, %v1885_v24  ;;  %v1739_v28 = vadd.f32 0.112945676, %v1738_v45  ;;  %v1633_v13 = vand.u32 2147483647, %v4395_v34  ;;  %2827 = vrcp.f32 %v4420_v46 }
 0x20f   : > { %v2826_v11 = vpop.eup %2825  ;;  %v1944_v55 = vadd.f32 1.0, %v2565_v51  ;;  %v1635_v63 = vand.u32 2147483648, %v4395_v34  ;;  %v4432_v26 = vadd.f32 1.0, %v1662_v3  ;;  %v1854_v29 = vmul.f32 3.8918573e-05, %v4213_v20 }
 0x210   : > { %v1625_v31 = vmul.f32 %v2826_v11, %v4395_v34  ;;  %v1814_v53 = vmul.f32 3.8918573e-05, %v4129_v40  ;;  %v1974_v5 = vmul.f32 %v1942_v25, %v4763_v48  ;;  %v1740_v6 = vmul.f32 %v1739_v28, %v4059_v35 }
 0x211   : > { %v1976_v39 = vmul.f32 %v1944_v55, %v4764_v22  ;;  %v1777_v57 = vadd.f32 0.014752088, %v1776_v7  ;;  %v4440_v62 = vmul.f32 %v1846_v54, %v4213_v20  ;;  %v4443_v36 = vmul.f32 %v1886_v49, %v4233_v47 }
 0x212   : > { %v1626_v32 = vsub.f32 1.0, %v1625_v31  ;;  %2829 = vrcp.f32 %v4432_v26  ;;  %vm1629_vm0 = vweird.f32 %v4395_v34  ;;  %vm1630_vm1 = vweird.f32 %v2826_v11 }
 0x213   : > { %v2012_v15 = vpack.c.bf16 %v1976_v39, %v1974_v5  ;;  %v1741_v52 = vadd.f32 0.4994258, %v1740_v6  ;;  %v1778_v2 = vmul.f32 %v1777_v57, %v4113_v41  ;;  %v1855_v33 = vadd.f32 0.001143296, %v1854_v29  ;;  %vm1631_vm4 = vmor %vm1629_vm0, %vm1630_vm1 }
 0x214   : > { %v1627_v27 = vmul.f32 %v2826_v11, %v1626_v32  ;;  %v1815_v10 = vadd.f32 0.001143296, %v1814_v53  ;;  %v2828_v58 = vpop.eup %2827  ;;  %vm4448_vm2 = vcmp.eq.f32.partialorder %v1633_v13, 8.507059e+37  ;;  %v1636_v8 = vor.u32 1.1754944e-38, %v1635_v63 }
 0x215   : > { %2227 = vmatmul.bf16.gmra.mxu3 %v2012_v15  ;;  %v1713_v4 = vand.u32 2147483647, %v4420_v46  ;;  %v1742_v24 = vmul.f32 %v1741_v52, %v4059_v35  ;;  %v1705_v19 = vmul.f32 %v2828_v58, %v4420_v46  ;;  %vm1709_vm3 = vweird.f32 %v4420_v46 }
 0x216   : > { %v1628_v50 = vadd.f32 %v2826_v11, %v1627_v27  ;;  %v1779_v38 = vadd.f32 0.112945676, %v1778_v2  ;;  %v1715_v42 = vand.u32 2147483648, %v4420_v46  ;;  %v1856_v17 = vmul.f32 %v1855_v33, %v4213_v20 }
 0x217   : > { %v4460_v14 = vadd.f32 1.0, %v1742_v24  ;;  %v1894_v30 = vmul.f32 3.8918573e-05, %v4233_v47  ;;  %v1706_v45 = vsub.f32 1.0, %v1705_v19  ;;  %v1816_v3 = vmul.f32 %v1815_v10, %v4129_v40 }
 0x218   : > { %v2830_v25 = vpop.eup %2829  ;;  %v1632_v35 = vsel %vm1631_vm4, %v2826_v11, %v1628_v50  ;;  %v1780_v51 = vmul.f32 %v1779_v38, %v4113_v41  ;;  %vm4468_vm5 = vcmp.eq.f32.partialorder %v1713_v4, 8.507059e+37  ;;  %vm1710_vm6 = vweird.f32 %v2828_v58 }
 0x219   : > { %v1637_v7 = vsel %vm4448_vm2, %v1636_v8, %v1632_v35  ;;  %v1665_v54 = vmul.f32 %v2830_v25, %v4432_v26  ;;  %2831 = vrcp.f32 %v4460_v14  ;;  %v1707_v28 = vmul.f32 %v2828_v58, %v1706_v45  ;;  %vm1711_vm7 = vmor %vm1709_vm3, %vm1710_vm6 }
 0x21a   : > { %v1638_v49 = vmul.f32 %v1637_v7, %v4153_v60  ;;  %v1673_v11 = vand.u32 2147483647, %v4432_v26  ;;  %v1716_v55 = vor.u32 1.1754944e-38, %v1715_v42  ;;  %v1781_v63 = vadd.f32 0.4994258, %v1780_v51  ;;  %v4769_v7 = vld [vmem:[#allocation27_spill] sm:$0xff] }
 0x21b   : > { %v1666_v13 = vsub.f32 1.0, %v1665_v54  ;;  %v1857_v31 = vadd.f32 0.014752088, %v1856_v17  ;;  %v1708_v29 = vadd.f32 %v2828_v58, %v1707_v28  ;;  %v1675_v53 = vand.u32 2147483648, %v4432_v26 }
 0x21c   : > { %v1817_v48 = vadd.f32 0.014752088, %v1816_v3  ;;  %v1895_v5 = vadd.f32 0.001143296, %v1894_v30  ;;  %vm1670_vm8 = vweird.f32 %v2830_v25  ;;  %v1782_v60 = vmul.f32 %v1781_v63, %v4113_v41 }
 0x21d   : > { %v1667_v22 = vmul.f32 %v2830_v25, %v1666_v13  ;;  %v1858_v39 = vmul.f32 %v1857_v31, %v4213_v20  ;;  %v2566_v6 = vclamps-f32 %v1638_v49, 1.0  ;;  %v1712_v57 = vsel %vm1711_vm7, %v2828_v58, %v1708_v29 }
 0x21e   : > { %vm1669_vm9 = vweird.f32 %v4432_v26  ;;  %v1818_v32 = vmul.f32 %v1817_v48, %v4129_v40  ;;  %v1717_v52 = vsel %vm4468_vm5, %v1716_v55, %v1712_v57  ;;  %v4485_v2 = vadd.f32 1.0, %v1782_v60 }
 0x21f   : > { %v2832_v15 = vpop.eup %2831  ;;  %v1668_v27 = vadd.f32 %v2830_v25, %v1667_v22  ;;  %v1859_v46 = vadd.f32 0.112945676, %v1858_v39  ;;  %v1718_v33 = vmul.f32 %v1717_v52, %v4271_v56  ;;  %vm1671_vm10 = vmor %vm1669_vm9, %vm1670_vm8  ;;  %v1676_v10 = vor.u32 1.1754944e-38, %v1675_v53 }
 0x220   : > { %v1745_v18 = vmul.f32 %v2832_v15, %v4460_v14  ;;  %v1896_v58 = vmul.f32 %v1895_v5, %v4233_v47  ;;  %vm1674_vm11 = vcmp.eq.f32.partialorder %v1673_v11, 8.507059e+37  ;;  %v1753_v26 = vand.u32 2147483647, %v4460_v14 }
 0x221   : > { %v1672_v8 = vsel %vm1671_vm10, %v2830_v25, %v1668_v27  ;;  %2833 = vrcp.f32 %v4485_v2  ;;  %v2568_v4 = vclamps-f32 %v1718_v33, 1.0  ;;  %v1945_v24 = vadd.f32 1.0, %v2566_v6 }
 0x222   : > { %v1677_v50 = vsel %vm1674_vm11, %v1676_v10, %v1672_v8  ;;  %v1746_v19 = vsub.f32 1.0, %v1745_v18  ;;  %v1755_v56 = vand.u32 2147483648, %v4460_v14  ;;  %v1860_v42 = vmul.f32 %v1859_v46, %v4213_v20  ;;  %v4772_v8 = vld [vmem:[#allocation33_spill] sm:$0xff] }
 0x223   : > { %v1678_v38 = vmul.f32 %v1677_v50, %v4156_v61  ;;  %v1819_v17 = vadd.f32 0.112945676, %v1818_v32  ;;  %v1947_v30 = vadd.f32 1.0, %v2568_v4  ;;  %vm1750_vm12 = vweird.f32 %v2832_v15  ;;  %v2154_v50 = vpop.f32.mrf.mxu2 }
 0x224   : > { %v1747_v35 = vmul.f32 %v2832_v15, %v1746_v19  ;;  %v1897_v25 = vadd.f32 0.014752088, %v1896_v58  ;;  %v1848_v45 = vadd.f32 0.05243302, %v4440_v62  ;;  %vm1749_vm13 = vweird.f32 %v4460_v14 }
 0x225   : > { %v1861_v51 = vadd.f32 0.4994258, %v1860_v42  ;;  %v1820_v3 = vmul.f32 %v1819_v17, %v4129_v40  ;;  %v1977_v34 = vmul.f32 %v1945_v24, %v4769_v7  ;;  %v1979_v61 = vmul.f32 %v1947_v30, %v4161_v23  ;;  %vm1751_vm14 = vmor %vm1749_vm13, %vm1750_vm12 }
 0x226   : > { %v1748_v54 = vadd.f32 %v2832_v15, %v1747_v35  ;;  %v1898_v49 = vmul.f32 %v1897_v25, %v4233_v47  ;;  %v2567_v11 = vclamps-f32 %v1678_v38, 1.0  ;;  %v1756_v55 = vor.u32 1.1754944e-38, %v1755_v56 }
 0x227   : > { %v2834_v28 = vpop.eup %2833  ;;  %v1862_v13 = vmul.f32 %v1861_v51, %v4213_v20  ;;  %v1821_v63 = vadd.f32 0.4994258, %v1820_v3  ;;  %v2013_v62 = vpack.c.bf16 %v1979_v61, %v1977_v34  ;;  %vm1754_vm15 = vcmp.eq.f32.partialorder %v1753_v26, 8.507059e+37  ;;  %v4539_v3 = vld [vmem:[%s4642_s4] ss:$0 sm:$0xff] }
 0x228   : > { %v1752_v31 = vsel %vm1751_vm14, %v2832_v15, %v1748_v54  ;;  %v1785_v14 = vmul.f32 %v2834_v28, %v4485_v2  ;;  %v1849_v29 = vmul.f32 %v1848_v45, %v4213_v20  ;;  %v1771_v5 = vmul.f32 %v4417_v16, %v4113_v41 }
 0x229   : > { %v1757_v53 = vsel %vm1754_vm15, %v1756_v55, %v1752_v31  ;;  %v4504_v48 = vadd.f32 1.0, %v1862_v13  ;;  %v1822_v23 = vmul.f32 %v1821_v63, %v4129_v40  ;;  %2183 = vmatmul.bf16.gmra.mxu2 %v2013_v62  ;;  %v1899_v39 = vadd.f32 0.112945676, %v1898_v49 }
 0x22a   : > { %v1758_v22 = vmul.f32 %v1757_v53, %v4414_v1  ;;  %v1786_v60 = vsub.f32 1.0, %v1785_v14  ;;  %v1888_v6 = vadd.f32 0.05243302, %v4443_v36  ;;  %v1946_v57 = vadd.f32 1.0, %v2567_v11 }
 0x22b   : > { %vm1790_vm0 = vweird.f32 %v2834_v28  ;;  %2835 = vrcp.f32 %v4504_v48  ;;  %v4512_v52 = vadd.f32 1.0, %v1822_v23  ;;  %v1900_v27 = vmul.f32 %v1899_v39, %v4233_v47 }
 0x22c   : > { %v2569_v32 = vclamps-f32 %v1758_v22, 1.0  ;;  %v1787_v15 = vmul.f32 %v2834_v28, %v1786_v60  ;;  %v1810_v46 = vadd.f32 0.18741608, %v4426_v21  ;;  %v1850_v41 = vadd.f32 0.18741608, %v1849_v29  ;;  %v2156_v29 = vpop.f32.mrf.mxu2 }
 0x22d   : > { %vm1789_vm1 = vweird.f32 %v4485_v2  ;;  %v1795_v1 = vand.u32 2147483648, %v4485_v2  ;;  %v1793_v36 = vand.u32 2147483647, %v4485_v2  ;;  %2837 = vrcp.f32 %v4512_v52  ;;  %v2203_v2 = vpop.f32.mrf.mxu3 }
 0x22e   : > { %v1948_v16 = vadd.f32 1.0, %v2569_v32  ;;  %v1788_v33 = vadd.f32 %v2834_v28, %v1787_v15  ;;  %v1889_v10 = vmul.f32 %v1888_v6, %v4233_v47  ;;  %vm4522_vm2 = vmor %vm1789_vm1, %vm1790_vm0  ;;  %v1901_v58 = vadd.f32 0.4994258, %v1900_v27 }
 0x22f   : > { %v1772_v21 = vadd.f32 1.1283791, %v1771_v5  ;;  %v1978_v26 = vmul.f32 %v1946_v57, %v4772_v8  ;;  %v1851_v38 = vmul.f32 %v1850_v41, %v4213_v20  ;;  %v1796_v56 = vor.u32 1.1754944e-38, %v1795_v1  ;;  %v4773_v41 = vld [vmem:[#allocation20_spill] sm:$0xff] }
 0x230   : > { %v1980_v4 = vmul.f32 %v1948_v16, %v4164_v44  ;;  %v1792_v24 = vsel %vm4522_vm2, %v2834_v28, %v1788_v33  ;;  %v1902_v42 = vmul.f32 %v1901_v58, %v4233_v47  ;;  %v1811_v17 = vmul.f32 %v1810_v46, %v4129_v40 }
 0x231   : > { %v2836_v19 = vpop.eup %2835  ;;  %vm1794_vm3 = vcmp.eq.f32.partialorder %v1793_v36, 8.507059e+37  ;;  %v1890_v25 = vadd.f32 0.18741608, %v1889_v10  ;;  %v2204_v51 = vadd.f32 %v2203_v2, %v2154_v50  ;;  %v1773_v7 = vmul.f32 %v1772_v21, %v4081_v12 }
 0x232   : > { %v2014_v30 = vpack.c.bf16 %v1980_v4, %v1978_v26  ;;  %v1865_v35 = vmul.f32 %v2836_v19, %v4504_v48  ;;  %v1797_v45 = vsel %vm1794_vm3, %v1796_v56, %v1792_v24  ;;  %v4534_v44 = vadd.f32 1.0, %v1902_v42 }
 0x233   : > { %v2838_v20 = vpop.eup %2837  ;;  %v1875_v40 = vand.u32 2147483648, %v4504_v48  ;;  %v1852_v61 = vadd.f32 1.1283791, %v1851_v38  ;;  %v1798_v49 = vmul.f32 %v1797_v45, %v1773_v7  ;;  %vm1870_vm4 = vweird.f32 %v2836_v19 }
 0x234   : > { %2232 = vmatmul.bf16.gmra.mxu3 %v2014_v30  ;;  %v1866_v34 = vsub.f32 1.0, %v1865_v35  ;;  %v1825_v54 = vmul.f32 %v2838_v20, %v4512_v52  ;;  %2839 = vrcp.f32 %v4534_v44  ;;  %v1873_v11 = vand.u32 2147483647, %v4504_v48  ;;  %v2159_v50 = vpop.f32.mrf.mxu2 }
 0x235   : > { %v1812_v55 = vadd.f32 1.1283791, %v1811_v17  ;;  %v1891_v13 = vmul.f32 %v1890_v25, %v4233_v47  ;;  %v2298_v12 = vadd.f32 %v4539_v3, %v2204_v51  ;;  %vm1869_vm5 = vweird.f32 %v4504_v48  ;;  %v2205_v53 = vpop.f32.mrf.mxu3 }
 0x236   : > { %v1867_v28 = vmul.f32 %v2836_v19, %v1866_v34  ;;  %v1826_v63 = vsub.f32 1.0, %v1825_v54  ;;  %v1876_v31 = vor.u32 1.1754944e-38, %v1875_v40  ;;  %v1835_v14 = vand.u32 2147483648, %v4512_v52  ;;  %vm1871_vm6 = vmor %vm1869_vm5, %vm1870_vm4 }
 0x237   : > { %vm1830_vm7 = vweird.f32 %v2838_v20  ;;  %v1833_v5 = vand.u32 2147483647, %v4512_v52  ;;  %2314 = vst [vmem:[%s4553_s3] sm:$0xff] %v2298_v12  ;;  %v2206_v47 = vadd.f32 %v2205_v53, %v2156_v29  ;;  %v1853_v22 = vmul.f32 %v1852_v61, %v4189_v37 }
 0x238   : > { %v1868_v62 = vadd.f32 %v2836_v19, %v1867_v28  ;;  %v1827_v23 = vmul.f32 %v2838_v20, %v1826_v63  ;;  %v2570_v60 = vclamps-f32 %v1798_v49, 1.0  ;;  %vm1874_vm8 = vcmp.eq.f32.partialorder %v1873_v11, 8.507059e+37 }
 0x239   : > { %vm1829_vm9 = vweird.f32 %v4512_v52  ;;  %v2299_v32 = vadd.f32 %v4539_v3, %v2206_v47  ;;  %v1836_v27 = vor.u32 1.1754944e-38, %v1835_v14  ;;  %v605_v1 = vmul.f32 0.5, %v4773_v41 }
 0x23a   : > { %v1872_v48 = vsel %vm1871_vm6, %v2836_v19, %v1868_v62  ;;  %v2840_v39 = vpop.eup %2839  ;;  %v1828_v57 = vadd.f32 %v2838_v20, %v1827_v23  ;;  %vm1831_vm10 = vmor %vm1829_vm9, %vm1830_vm7  ;;  %v1813_v37 = vmul.f32 %v1812_v55, %v4099_v59  ;;  %vm1834_vm11 = vcmp.eq.f32.partialorder %v1833_v5, 8.507059e+37 }
 0x23b   : > { %v1877_v6 = vsel %vm1874_vm8, %v1876_v31, %v1872_v48  ;;  %v1905_v46 = vmul.f32 %v2840_v39, %v4534_v44  ;;  %2315 = vst [vmem:[%s4553_s3 + $0x8] sm:$0xff] %v2299_v32  ;;  %v1949_v36 = vadd.f32 1.0, %v2570_v60  ;;  %v607_v52 = vmul.f32 0.5, %v4177_v43 }
 0x23c   : > { %v1878_v15 = vmul.f32 %v1877_v6, %v1853_v22  ;;  %v1832_v16 = vsel %vm1831_vm10, %v2838_v20, %v1828_v57  ;;  %v1892_v58 = vadd.f32 1.1283791, %v1891_v13  ;;  %v1913_v21 = vand.u32 2147483647, %v4534_v44  ;;  %v2161_v34 = vpop.f32.mrf.mxu2 }
 0x23d   : > { %v1837_v10 = vsel %vm1834_vm11, %v1836_v27, %v1832_v16  ;;  %v1906_v18 = vsub.f32 1.0, %v1905_v46  ;;  %v1915_v8 = vand.u32 2147483648, %v4534_v44  ;;  %vm1910_vm12 = vweird.f32 %v2840_v39  ;;  %v2208_v59 = vpop.f32.mrf.mxu3 }
 0x23e   : > { %v2572_v33 = vclamps-f32 %v1878_v15, 1.0  ;;  %v1838_v4 = vmul.f32 %v1837_v10, %v1813_v37  ;;  %v2209_v2 = vadd.f32 %v2208_v59, %v2159_v50  ;;  %v1981_v19 = vmul.f32 %v1949_v36, %v605_v1 }
 0x23f   : > { %v1907_v24 = vmul.f32 %v2840_v39, %v1906_v18  ;;  %vm1909_vm13 = vweird.f32 %v4534_v44  ;;  %v1893_v43 = vmul.f32 %v1892_v58, %v4198_v0  ;;  %v1916_v42 = vor.u32 1.1754944e-38, %v1915_v8  ;;  %v4774_v0 = vld [vmem:[#allocation22_spill] sm:$0xff] }
 0x240   : > { %v1951_v26 = vadd.f32 1.0, %v2572_v33  ;;  %vm1911_vm14 = vmor %vm1909_vm13, %vm1910_vm12  ;;  %v2300_v17 = vadd.f32 %v4539_v3, %v2209_v2  ;;  %v2571_v35 = vclamps-f32 %v1838_v4, 1.0  ;;  %vm1914_vm15 = vcmp.eq.f32.partialorder %v1913_v21, 8.507059e+37 }
 0x241   : > { %v1908_v56 = vadd.f32 %v2840_v39, %v1907_v24  ;;  %v606_v61 = vmul.f32 0.5, %v4774_v0  ;;  %v608_v54 = vmul.f32 0.5, %v4184_v9 }
 0x242   : > { %v1983_v38 = vmul.f32 %v1951_v26, %v607_v52  ;;  %2316 = vst [vmem:[%s4553_s3 + $0x10] sm:$0xff] %v2300_v17  ;;  %v1950_v7 = vadd.f32 1.0, %v2571_v35 }
 0x243   : > { %v1912_v25 = vsel %vm1911_vm14, %v2840_v39, %v1908_v56 }
 0x244   : > { %v2015_v30 = vpack.c.bf16 %v1983_v38, %v1981_v19  ;;  %v1917_v45 = vsel %vm1914_vm15, %v1916_v42, %v1912_v25  ;;  %v1982_v11 = vmul.f32 %v1950_v7, %v606_v61  ;;  %v2164_v63 = vpop.f32.mrf.mxu2 }
 0x245   : > { %v1918_v51 = vmul.f32 %v1917_v45, %v1893_v43  ;;  %v2210_v44 = vpop.f32.mrf.mxu3 }
 0x246   : > { %2188 = vmatmul.bf16.gmra.mxu2 %v2015_v30  ;;  %v2211_v40 = vadd.f32 %v2210_v44, %v2161_v34 }
 0x247   : > { %v2573_v20 = vclamps-f32 %v1918_v51, 1.0 }
 0x248   : > { %v2301_v28 = vadd.f32 %v4539_v3, %v2211_v40 }
 0x249   : > { %v1952_v49 = vadd.f32 1.0, %v2573_v20 }
 0x24a   : > { %2317 = vst [vmem:[%s4553_s3 + $0x18] sm:$0xff] %v2301_v28 }
 0x24b   : > { %v1984_v55 = vmul.f32 %v1952_v49, %v608_v54 }
 0x24c   : > { %v2166_v14 = vpop.f32.mrf.mxu2 }
 0x24d   : > { %v2016_v13 = vpack.c.bf16 %v1984_v55, %v1982_v11  ;;  %v2213_v12 = vpop.f32.mrf.mxu3 }
 0x24e   : > { %v2214_v62 = vadd.f32 %v2213_v12, %v2164_v63 }
 0x24f   : > { %2237 = vmatmul.bf16.gmra.mxu3 %v2016_v13 }
 0x250   : > { %v2302_v31 = vadd.f32 %v4539_v3, %v2214_v62 }
 0x252   : > { %2318 = vst [vmem:[%s4553_s3 + $0x20] sm:$0xff] %v2302_v31 }
 0x254   : > { %v2169_v23 = vpop.f32.mrf.mxu2 }
 0x255   : > { %v2215_v29 = vpop.f32.mrf.mxu3 }
 0x256   : > { %v2216_v9 = vadd.f32 %v2215_v29, %v2166_v14 }
 0x258   : > { %v2303_v53 = vadd.f32 %v4539_v3, %v2216_v9 }
 0x25a   : > { %2319 = vst [vmem:[%s4553_s3 + $0x28] sm:$0xff] %v2303_v53 }
 0x25c   : > { %v2171_v60 = vpop.f32.mrf.mxu2 }
 0x25d   : > { %v2218_v5 = vpop.f32.mrf.mxu3 }
 0x25e   : > { %v2219_v47 = vadd.f32 %v2218_v5, %v2169_v23 }
 0x260   : > { %v2304_v22 = vadd.f32 %v4539_v3, %v2219_v47 }
 0x262   : > { %2320 = vst [vmem:[%s4553_s3 + $0x30] sm:$0xff] %v2304_v22 }
 0x265   : > { %v2220_v48 = vpop.f32.mrf.mxu3 }
 0x266   : > { %v2221_v39 = vadd.f32 %v2220_v48, %v2171_v60 }
 0x268   : > { %v2305_v6 = vadd.f32 %v4539_v3, %v2221_v39 }
 0x26a   : > { %2321 = vst [vmem:[%s4553_s3 + $0x38] sm:$0xff] %v2305_v6 }
 0x26f   : > { %v2174_v57 = vpop.f32.mrf.mxu2 }
 0x277   : > { %v2176_v46 = vpop.f32.mrf.mxu2 }
 0x283   : > { %v2223_v32 = vpop.f32.mrf.mxu3 }
 0x284   : > { %v2224_v15 = vadd.f32 %v2223_v32, %v2174_v57 }
 0x286   : > { %v2306_v27 = vadd.f32 %v4539_v3, %v2224_v15 }
 0x288   : > { %2322 = vst [vmem:[%s4553_s3 + $0x40] sm:$0xff] %v2306_v27 }
 0x28b   : > { %v2225_v41 = vpop.f32.mrf.mxu3 }
 0x28c   : > { %v2226_v1 = vadd.f32 %v2225_v41, %v2176_v46 }
 0x28e   : > { %v2307_v37 = vadd.f32 %v4539_v3, %v2226_v1 }
 0x28f   : > { %v2179_v16 = vpop.f32.mrf.mxu2 }
 0x290   : > { %2323 = vst [vmem:[%s4553_s3 + $0x48] sm:$0xff] %v2307_v37 }
 0x297   : > { %v2181_v18 = vpop.f32.mrf.mxu2 }
 0x298   : > { %v2228_v33 = vpop.f32.mrf.mxu3 }
 0x299   : > { %v2229_v36 = vadd.f32 %v2228_v33, %v2179_v16 }
 0x29b   : > { %v2308_v10 = vadd.f32 %v4539_v3, %v2229_v36 }
 0x29d   : > { %2324 = vst [vmem:[%s4553_s3 + $0x50] sm:$0xff] %v2308_v10 }
 0x2a0   : > { %v2230_v52 = vpop.f32.mrf.mxu3 }
 0x2a1   : > { %v2231_v58 = vadd.f32 %v2230_v52, %v2181_v18 }
 0x2a3   : > { %v2309_v21 = vadd.f32 %v4539_v3, %v2231_v58 }
 0x2a5   : > { %2325 = vst [vmem:[%s4553_s3 + $0x58] sm:$0xff] %v2309_v21 }
 0x2ac   : > { %v2184_v8 = vpop.f32.mrf.mxu2 }
 0x2b4   : > { %v2186_v50 = vpop.f32.mrf.mxu2 }
 0x2b7   : > { %v2233_v26 = vpop.f32.mrf.mxu3 }
 0x2b8   : > { %v2234_v4 = vadd.f32 %v2233_v26, %v2184_v8 }
 0x2ba   : > { %v2310_v24 = vadd.f32 %v4539_v3, %v2234_v4 }
 0x2bc   : > { %2326 = vst [vmem:[%s4553_s3 + $0x60] sm:$0xff] %v2310_v24 }
 0x2bf   : > { %v2235_v59 = vpop.f32.mrf.mxu3 }
 0x2c0   : > { %v2236_v2 = vadd.f32 %v2235_v59, %v2186_v50 }
 0x2c2   : > { %v2311_v19 = vadd.f32 %v4539_v3, %v2236_v2 }
 0x2c4   : > { %2327 = vst [vmem:[%s4553_s3 + $0x68] sm:$0xff] %v2311_v19 }
 0x2c9   : > { %v2189_v38 = vpop.f32.mrf.mxu2 }
 0x2d1   : > { %v2191_v17 = vpop.f32.mrf.mxu2 }
 0x2d2   : > { %v2238_v56 = vpop.f32.mrf.mxu3 }
 0x2d3   : > { %v2239_v43 = vadd.f32 %v2238_v56, %v2189_v38 }
 0x2d5   : > { %v2312_v42 = vadd.f32 %v4539_v3, %v2239_v43 }
 0x2d7   : > { %2328 = vst [vmem:[%s4553_s3 + $0x70] sm:$0xff] %v2312_v42 }
 0x2da   : > { %v2240_v30 = vpop.f32.mrf.mxu3 }
 0x2db   : > { %v2241_v35 = vadd.f32 %v2240_v30, %v2191_v17 }
 0x2dd   : > { %v2313_v25 = vadd.f32 %v4539_v3, %v2241_v35 }
 0x2df   : > { %2329 = vst [vmem:[%s4553_s3 + $0x78] sm:$0xff] %v2313_v25 }
 0x2e0   : > { %2988 = shalt.err (!%p2985_p0)
}
 0x2e1   : > { %s3060_s10 = smov 128   ;;  %s3061_s14 = smov 8  }
 0x2e2   : > { %2691 = dma.vmem_to_hbm [thread:$0]  (%p3184_p3), %s2344_s16, 2048, %s2346_s11, %s2331_s6, %s3060_s10, %s3060_s10, %s3061_s14  }
 0x2e3 PF: > { %s2360_s1 = sand.u32 1, %s3031_s18   ;;  %p2708_p5 = pnand %p2468_p11, %p3141_p6 }
 0x2e4   : > { %s2361_s2 = scalar_lea.sflag [#allocation5], %s2360_s1 }
 0x2e5   : > { %p2709_p7 = pneg %p2708_p5 }
 0x2e7   : > { %3026 = dma.done.wait (%p2709_p7), %s2361_s2, 2048  }
 0x2e8   : > { %3028 = vsyncadd (%p2709_p7), %s2361_s2, 4294965248  ;;  %s23_s23 = sadd.s32 1, %s3051_s23   ;;  %s4775_s18 = smov %s3035_s19 }
 0x2e9   : > { %p20_p9 = scmp.ge.s32.totalorder %s23_s23, 4   ;;  %s4776_s19 = smov %s3039_s20 }
 0x2ea   : > { %s4777_s20 = smov %s3200_s27  ;;  %s4778_s21 = smov %s3047_s22 }
 0x2eb   : > { %s4779_s22 = smov %s4781_s17  ;;  %22 = sbr.rel (!%p20_p9) target bundleno = 12 (0xc), region = 108 }
 0x2f0   :  { %2367 = vsyncpa [#allocation4], 1 }
 0x2f1   :  { %2369 = vsyncpa [#allocation4 + $0x1], 1 }
 0x2f2   :  { %2370 = vsyncpa [#allocation7], 1 }
 0x2f3   :  { %2371 = vsyncpa [#allocation10], 1 }
 0x2f4   :  { %2372 = vsyncpa [#allocation5], 1 }
 0x2f5   :  { %2374 = vsyncpa [#allocation5 + $0x1], 1 }

</bundles_post_ra>
